<compile_context>
chip_gen: v6e
topology: v6e:2x2x1
jax: 0.10.0
libtpu: 0.0.40
codegen_flags: <defaults>
</compile_context>

<pallas_src>
import functools

import jax
import jax.numpy as jnp
from jax import lax
from jax.experimental import pallas as pl
from jax.experimental.pallas import tpu as pltpu

INPUT_DIM = 5
HIDDEN1 = 256
HIDDEN2 = 512
LN_EPS = 1e-5


def _round_up(n, m):
    return ((n + m - 1) // m) * m


# ----------------------------------------------------------------------------
# Elementwise math (f32, used inside the kernel)
# ----------------------------------------------------------------------------
_ERF_P = 0.3275911
_ERF_A = (0.254829592, -0.284496736, 1.421413741, -1.453152027, 1.061405429)


def _erf_approx(x):
    """Abramowitz & Stegun 7.1.26 rational erf approximation, |abs err| <= 1.5e-7."""
    a1, a2, a3, a4, a5 = _ERF_A
    ax = jnp.abs(x)
    t = 1.0 / (1.0 + _ERF_P * ax)
    poly = ((((a5 * t + a4) * t + a3) * t + a2) * t + a1) * t
    y = 1.0 - poly * jnp.exp(-(ax * ax))
    return jnp.where(x < 0.0, -y, y)


def _gelu(x, approximate):
    if approximate:
        # tanh-GELU: transcendental goes to the EUP slot (VALU relief on v6e/v7x).
        c = 0.7978845608028654  # sqrt(2/pi)
        return 0.5 * x * (1.0 + jnp.tanh(c * (x + 0.044715 * x * x * x)))
    # Exact erf-GELU (PyTorch nn.GELU() default), via rational approximation.
    return 0.5 * x * (1.0 + _erf_approx(x * 0.7071067811865475))


def _layer_norm(x, gamma, beta):
    mean = jnp.mean(x, axis=-1, keepdims=True)
    var = jnp.mean(jnp.square(x - mean), axis=-1, keepdims=True)
    return (x - mean) * lax.rsqrt(var + LN_EPS) * gamma + beta


# ----------------------------------------------------------------------------
# Kernel
# ----------------------------------------------------------------------------
def feature_extractor_kernel(
    x_ref,
    w1_ref, b1_ref, g1_ref, be1_ref,
    wp_ref, bp_ref,            # packed [residual_proj | hidden_layer] weights/bias
    g2_ref, be2_ref,
    o_ref,
    *, approximate_gelu,
):
    x = x_ref[...].astype(jnp.float32)

    # input_layer -> layer_norm1 -> GELU -> (dropout1: identity at eval)
    # K=5 matmul: negligible FLOPs; stays f32 on the MXU (which has slack).
    x1 = jnp.dot(x, w1_ref[...], preferred_element_type=jnp.float32) + b1_ref[...]
    x1 = _layer_norm(x1, g1_ref[...], be1_ref[...])
    x1 = _gelu(x1, approximate_gelu)

    # Fused (residual_proj | hidden_layer): ONE bf16 MXU matmul, f32 accumulation.
    # Columns [0:512) = residual projection, [512:1024) = hidden pre-activation.
    h = jnp.dot(
        x1.astype(jnp.bfloat16), wp_ref[...], preferred_element_type=jnp.float32
    ) + bp_ref[...]
    residual = h[:, :HIDDEN2]
    x2 = h[:, HIDDEN2:]

    # layer_norm2 -> GELU -> (dropout2: identity at eval) -> residual add
    x2 = _layer_norm(x2, g2_ref[...], be2_ref[...])
    x2 = _gelu(x2, approximate_gelu)

    o_ref[...] = (x2 + residual).astype(o_ref.dtype)


# ----------------------------------------------------------------------------
# Wrapper
# ----------------------------------------------------------------------------
def prepare_params(params):
    """One-time weight packing (run once by the caller, NOT per forward call).

    Packs residual_proj / hidden_layer weights into one (256, 1024) bf16 matrix
    (halves DMA, native MXU dtype) and concatenates their f32 biases.
    """
    (w1, b1, g1, be1, wr, br, w2, b2, g2, be2) = params
    wp = jnp.concatenate([wr, w2], axis=1).astype(jnp.bfloat16)
    bp = jnp.concatenate([br, b2], axis=1).astype(jnp.float32)
    return (
        jnp.asarray(w1, jnp.float32), jnp.asarray(b1, jnp.float32),
        jnp.asarray(g1, jnp.float32), jnp.asarray(be1, jnp.float32),
        wp, bp,
        jnp.asarray(g2, jnp.float32), jnp.asarray(be2, jnp.float32),
    )


@functools.partial(jax.jit, static_argnames=("batch_tile", "approximate_gelu"))
def feature_extractor(x, packed_params, *, batch_tile=1024, approximate_gelu=False):
    """x: [B, INPUT_DIM] f32 -> [B, HIDDEN2] f32 (uses prepare_params() output)."""
    B, F = x.shape
    assert F == INPUT_DIM
    (w1, b1, g1, be1, wp, bp, g2, be2) = packed_params

    # Tile selection:
    #  * large default tile (amortize the ~0.35us per-grid-step cost),
    #  * but capped at ~ceil(B/2) so there are >= 2 grid steps when B allows it
    #    (lets v7x's two TensorCores both work via the "parallel" axis),
    #  * always a multiple of 8 (sublane granularity).
    if B >= 16:
        eff_tile = min(batch_tile, _round_up((B + 1) // 2, 8))
    else:
        eff_tile = _round_up(max(B, 1), 8)
    eff_tile = _round_up(eff_tile, 8)
    grid = (pl.cdiv(B, eff_tile),)

    x_spec = pl.BlockSpec((eff_tile, F), lambda i: (i, 0))
    out_spec = pl.BlockSpec((eff_tile, HIDDEN2), lambda i: (i, 0))

    def const_spec(p):
        # Full (untiled) parameter block, resident across all grid steps.
        return pl.BlockSpec(p.shape, lambda i: (0,) * p.ndim)

    param_list = [w1, b1, g1, be1, wp, bp, g2, be2]
    in_specs = [x_spec] + [const_spec(p) for p in param_list]

    kernel = functools.partial(
        feature_extractor_kernel, approximate_gelu=approximate_gelu
    )

    return pl.pallas_call(
        kernel,
        out_shape=jax.ShapeDtypeStruct((B, HIDDEN2), jnp.float32),
        grid=grid,
        in_specs=in_specs,
        out_specs=out_spec,
        compiler_params=pltpu.CompilerParams(
            dimension_semantics=("parallel",),
            vmem_limit_bytes=48 * 1024 * 1024,
        ),
    )(x, *param_list)


# ----------------------------------------------------------------------------
# Params / reference / test
# ----------------------------------------------------------------------------
def init_params(key):
    """Deterministic parameter init (shapes match the PyTorch module)."""
    k1, k2, k3, k4, k5, k6 = jax.random.split(key, 6)

    def linear(kw, kb, fan_in, fan_out):
        bound = 1.0 / jnp.sqrt(fan_in)
        w = jax.random.uniform(kw, (fan_in, fan_out), jnp.float32, -bound, bound)
        b = jax.random.uniform(kb, (1, fan_out), jnp.float32, -bound, bound)
        return w, b

    w1, b1 = linear(k1, k2, INPUT_DIM, HIDDEN1)     # input_layer
    w2, b2 = linear(k3, k4, HIDDEN1, HIDDEN2)       # hidden_layer
    wr, br = linear(k5, k6, HIDDEN1, HIDDEN2)       # residual_proj

    # LayerNorm affine params (PyTorch default: ones / zeros)
    g1 = jnp.ones((1, HIDDEN1), jnp.float32)
    be1 = jnp.zeros((1, HIDDEN1), jnp.float32)
    g2 = jnp.ones((1, HIDDEN2), jnp.float32)
    be2 = jnp.zeros((1, HIDDEN2), jnp.float32)

    return (w1, b1, g1, be1, wr, br, w2, b2, g2, be2)


def reference(x, params):
    """Pure-JAX f32 reference (matches the PyTorch eval-mode forward)."""
    (w1, b1, g1, be1, wr, br, w2, b2, g2, be2) = params
    x1 = x @ w1 + b1
    x1 = _layer_norm(x1, g1, be1)
    x1 = jax.nn.gelu(x1, approximate=False)
    residual = x1 @ wr + br
    x2 = x1 @ w2 + b2
    x2 = _layer_norm(x2, g2, be2)
    x2 = jax.nn.gelu(x2, approximate=False)
    return x2 + residual


if __name__ == "__main__":
    key = jax.random.PRNGKey(0)
    kx, kp = jax.random.split(key)
    params = init_params(kp)
    packed = prepare_params(params)   # one-time weight packing (out of the hot path)

    # B=16 -> two 8-row grid steps; B=12 -> single ragged (masked) block;
    # B=100 -> two steps with a ragged final block. All exercise small shapes.
    for B in (16, 12, 100):
        x = jax.random.normal(jax.random.fold_in(kx, B), (B, INPUT_DIM), jnp.float32)

        out = jax.block_until_ready(feature_extractor(x, packed))
        ref = reference(x, params)

        assert out.shape == (B, HIDDEN2)
        # Tolerance relaxed vs pure-f32 reference: the fused residual/hidden
        # matmul runs with bf16 operands (f32 accumulation).
        assert jnp.allclose(out, ref, atol=2e-2, rtol=2e-2), (
            f"B={B}: max abs err {jnp.max(jnp.abs(out - ref))}"
        )

    # Optional EUP-friendly tanh-GELU path (VALU-pressure relief on v6e/v7x).
    x = jax.random.normal(jax.random.fold_in(kx, 7), (16, INPUT_DIM), jnp.float32)
    out = jax.block_until_ready(feature_extractor(x, packed, approximate_gelu=True))
    ref = reference(x, params)
    assert jnp.allclose(out, ref, atol=3e-2, rtol=3e-2), (
        f"approx-gelu: max abs err {jnp.max(jnp.abs(out - ref))}"
    )

    print("KERNEL_OK")
</pallas_src>

<mosaic_0001>
module attributes {stable_mosaic.version = 11 : i64} {
  func.func @feature_extractor_kernel(%arg0: i32, %arg1: memref<8x5xf32, #tpu.memory_space<vmem>>, %arg2: memref<5x256xf32, #tpu.memory_space<vmem>>, %arg3: memref<1x256xf32, #tpu.memory_space<vmem>>, %arg4: memref<1x256xf32, #tpu.memory_space<vmem>>, %arg5: memref<1x256xf32, #tpu.memory_space<vmem>>, %arg6: memref<256x1024xbf16, #tpu.memory_space<vmem>>, %arg7: memref<1x1024xf32, #tpu.memory_space<vmem>>, %arg8: memref<1x512xf32, #tpu.memory_space<vmem>>, %arg9: memref<1x512xf32, #tpu.memory_space<vmem>>, %arg10: memref<8x512xf32, #tpu.memory_space<vmem>>) attributes {dimension_semantics = [#tpu.dimension_semantics<parallel>], iteration_bounds = array<i64: 2>, scalar_prefetch = 0 : i64, scratch_operands = 0 : i64, tpu.core_type = #tpu.core_type<tc>, window_params = [{transform_indices = @transform_0, window_bounds = array<i64: 8, 5>}, {pipeline_mode = #tpu.pipeline_mode<synchronous>, transform_indices = @transform_1, window_bounds = array<i64: 5, 256>}, {pipeline_mode = #tpu.pipeline_mode<synchronous>, transform_indices = @transform_2, window_bounds = array<i64: 1, 256>}, {pipeline_mode = #tpu.pipeline_mode<synchronous>, transform_indices = @transform_3, window_bounds = array<i64: 1, 256>}, {pipeline_mode = #tpu.pipeline_mode<synchronous>, transform_indices = @transform_4, window_bounds = array<i64: 1, 256>}, {pipeline_mode = #tpu.pipeline_mode<synchronous>, transform_indices = @transform_5, window_bounds = array<i64: 256, 1024>}, {pipeline_mode = #tpu.pipeline_mode<synchronous>, transform_indices = @transform_6, window_bounds = array<i64: 1, 1024>}, {pipeline_mode = #tpu.pipeline_mode<synchronous>, transform_indices = @transform_7, window_bounds = array<i64: 1, 512>}, {pipeline_mode = #tpu.pipeline_mode<synchronous>, transform_indices = @transform_8, window_bounds = array<i64: 1, 512>}, {transform_indices = @transform_9, window_bounds = array<i64: 8, 512>}]} {
    %c0 = arith.constant 0 : index
    %c0_0 = arith.constant 0 : index
    %0 = vector.load %arg1[%c0, %c0_0] : memref<8x5xf32, #tpu.memory_space<vmem>>, vector<8x5xf32>
    %c0_1 = arith.constant 0 : index
    %c0_2 = arith.constant 0 : index
    %1 = vector.load %arg2[%c0_1, %c0_2] : memref<5x256xf32, #tpu.memory_space<vmem>>, vector<5x256xf32>
    %cst = arith.constant dense<0.000000e+00> : vector<8x256xf32>
    %2 = tpu.matmul %0, %1, %cst {dimension_numbers = #tpu.dot_dimension_numbers<[1], [0], [0], [1], [0, 0, 1, 1], [], []>} : vector<8x5xf32>, vector<5x256xf32>, vector<8x256xf32> -> vector<8x256xf32>
    %c0_3 = arith.constant 0 : index
    %c0_4 = arith.constant 0 : index
    %3 = vector.load %arg3[%c0_3, %c0_4] : memref<1x256xf32, #tpu.memory_space<vmem>>, vector<1x256xf32>
    %4 = vector.broadcast %3 : vector<1x256xf32> to vector<8x256xf32>
    %5 = arith.addf %2, %4 : vector<8x256xf32>
    %c0_5 = arith.constant 0 : index
    %c0_6 = arith.constant 0 : index
    %6 = vector.load %arg4[%c0_5, %c0_6] : memref<1x256xf32, #tpu.memory_space<vmem>>, vector<1x256xf32>
    %c0_7 = arith.constant 0 : index
    %c0_8 = arith.constant 0 : index
    %7 = vector.load %arg5[%c0_7, %c0_8] : memref<1x256xf32, #tpu.memory_space<vmem>>, vector<1x256xf32>
    %cst_9 = arith.constant dense<0.000000e+00> : vector<8xf32>
    %8 = vector.multi_reduction <add>, %5, %cst_9 [1] : vector<8x256xf32> to vector<8xf32>
    %9 = vector.shape_cast %8 : vector<8xf32> to vector<8x1xf32>
    %cst_10 = arith.constant 2.560000e+02 : f32
    %10 = vector.broadcast %cst_10 : f32 to vector<8x1xf32>
    %11 = arith.divf %9, %10 : vector<8x1xf32>
    %12 = vector.broadcast %11 : vector<8x1xf32> to vector<8x256xf32>
    %13 = arith.subf %5, %12 : vector<8x256xf32>
    %14 = arith.mulf %13, %13 : vector<8x256xf32>
    %cst_11 = arith.constant dense<0.000000e+00> : vector<8xf32>
    %15 = vector.multi_reduction <add>, %14, %cst_11 [1] : vector<8x256xf32> to vector<8xf32>
    %16 = vector.shape_cast %15 : vector<8xf32> to vector<8x1xf32>
    %cst_12 = arith.constant 2.560000e+02 : f32
    %17 = vector.broadcast %cst_12 : f32 to vector<8x1xf32>
    %18 = arith.divf %16, %17 : vector<8x1xf32>
    %19 = vector.broadcast %11 : vector<8x1xf32> to vector<8x256xf32>
    %20 = arith.subf %5, %19 : vector<8x256xf32>
    %cst_13 = arith.constant 9.99999974E-6 : f32
    %21 = vector.broadcast %cst_13 : f32 to vector<8x1xf32>
    %22 = arith.addf %18, %21 : vector<8x1xf32>
    %23 = math.rsqrt %22 : vector<8x1xf32>
    %24 = vector.broadcast %23 : vector<8x1xf32> to vector<8x256xf32>
    %25 = arith.mulf %20, %24 : vector<8x256xf32>
    %26 = vector.broadcast %6 : vector<1x256xf32> to vector<8x256xf32>
    %27 = arith.mulf %25, %26 : vector<8x256xf32>
    %28 = vector.broadcast %7 : vector<1x256xf32> to vector<8x256xf32>
    %29 = arith.addf %27, %28 : vector<8x256xf32>
    %cst_14 = arith.constant 5.000000e-01 : f32
    %30 = vector.broadcast %cst_14 : f32 to vector<8x256xf32>
    %31 = arith.mulf %30, %29 : vector<8x256xf32>
    %cst_15 = arith.constant 0.707106769 : f32
    %32 = vector.broadcast %cst_15 : f32 to vector<8x256xf32>
    %33 = arith.mulf %29, %32 : vector<8x256xf32>
    %34 = math.absf %33 : vector<8x256xf32>
    %cst_16 = arith.constant 0.327591091 : f32
    %35 = vector.broadcast %cst_16 : f32 to vector<8x256xf32>
    %36 = arith.mulf %35, %34 : vector<8x256xf32>
    %cst_17 = arith.constant 1.000000e+00 : f32
    %37 = vector.broadcast %cst_17 : f32 to vector<8x256xf32>
    %38 = arith.addf %37, %36 : vector<8x256xf32>
    %cst_18 = arith.constant 1.000000e+00 : f32
    %39 = vector.broadcast %cst_18 : f32 to vector<8x256xf32>
    %40 = arith.divf %39, %38 : vector<8x256xf32>
    %cst_19 = arith.constant 1.06140542 : f32
    %41 = vector.broadcast %cst_19 : f32 to vector<8x256xf32>
    %42 = arith.mulf %41, %40 : vector<8x256xf32>
    %cst_20 = arith.constant -1.45315206 : f32
    %43 = vector.broadcast %cst_20 : f32 to vector<8x256xf32>
    %44 = arith.addf %42, %43 : vector<8x256xf32>
    %45 = arith.mulf %44, %40 : vector<8x256xf32>
    %cst_21 = arith.constant 1.42141378 : f32
    %46 = vector.broadcast %cst_21 : f32 to vector<8x256xf32>
    %47 = arith.addf %45, %46 : vector<8x256xf32>
    %48 = arith.mulf %47, %40 : vector<8x256xf32>
    %cst_22 = arith.constant -0.284496725 : f32
    %49 = vector.broadcast %cst_22 : f32 to vector<8x256xf32>
    %50 = arith.addf %48, %49 : vector<8x256xf32>
    %51 = arith.mulf %50, %40 : vector<8x256xf32>
    %cst_23 = arith.constant 0.254829586 : f32
    %52 = vector.broadcast %cst_23 : f32 to vector<8x256xf32>
    %53 = arith.addf %51, %52 : vector<8x256xf32>
    %54 = arith.mulf %53, %40 : vector<8x256xf32>
    %55 = arith.mulf %34, %34 : vector<8x256xf32>
    %cst_24 = arith.constant 0.000000e+00 : f32
    %56 = vector.broadcast %cst_24 : f32 to vector<8x256xf32>
    %57 = arith.subf %56, %55 : vector<8x256xf32>
    %58 = math.exp %57 : vector<8x256xf32>
    %59 = arith.mulf %54, %58 : vector<8x256xf32>
    %cst_25 = arith.constant 1.000000e+00 : f32
    %60 = vector.broadcast %cst_25 : f32 to vector<8x256xf32>
    %61 = arith.subf %60, %59 : vector<8x256xf32>
    %cst_26 = arith.constant 0.000000e+00 : f32
    %62 = vector.broadcast %cst_26 : f32 to vector<8x256xf32>
    %63 = arith.cmpf olt, %33, %62 : vector<8x256xf32>
    %cst_27 = arith.constant 0.000000e+00 : f32
    %64 = vector.broadcast %cst_27 : f32 to vector<8x256xf32>
    %65 = arith.subf %64, %61 : vector<8x256xf32>
    %66 = arith.select %63, %65, %61 : vector<8x256xi1>, vector<8x256xf32>
    %cst_28 = arith.constant 1.000000e+00 : f32
    %67 = vector.broadcast %cst_28 : f32 to vector<8x256xf32>
    %68 = arith.addf %67, %66 : vector<8x256xf32>
    %69 = arith.mulf %31, %68 : vector<8x256xf32>
    %70 = arith.truncf %69 : vector<8x256xf32> to vector<8x256xbf16>
    %c0_29 = arith.constant 0 : index
    %c0_30 = arith.constant 0 : index
    %71 = vector.load %arg6[%c0_29, %c0_30] : memref<256x1024xbf16, #tpu.memory_space<vmem>>, vector<256x1024xbf16>
    %cst_31 = arith.constant dense<0.000000e+00> : vector<8x1024xf32>
    %72 = tpu.matmul %70, %71, %cst_31 {dimension_numbers = #tpu.dot_dimension_numbers<[1], [0], [0], [1], [0, 0, 1, 1], [], []>} : vector<8x256xbf16>, vector<256x1024xbf16>, vector<8x1024xf32> -> vector<8x1024xf32>
    %c0_32 = arith.constant 0 : index
    %c0_33 = arith.constant 0 : index
    %73 = vector.load %arg7[%c0_32, %c0_33] : memref<1x1024xf32, #tpu.memory_space<vmem>>, vector<1x1024xf32>
    %74 = vector.broadcast %73 : vector<1x1024xf32> to vector<8x1024xf32>
    %75 = arith.addf %72, %74 : vector<8x1024xf32>
    %76 = vector.extract_strided_slice %75 {offsets = [0, 0], sizes = [8, 512], strides = [1, 1]} : vector<8x1024xf32> to vector<8x512xf32>
    %77 = vector.extract_strided_slice %75 {offsets = [0, 512], sizes = [8, 512], strides = [1, 1]} : vector<8x1024xf32> to vector<8x512xf32>
    %c0_34 = arith.constant 0 : index
    %c0_35 = arith.constant 0 : index
    %78 = vector.load %arg8[%c0_34, %c0_35] : memref<1x512xf32, #tpu.memory_space<vmem>>, vector<1x512xf32>
    %c0_36 = arith.constant 0 : index
    %c0_37 = arith.constant 0 : index
    %79 = vector.load %arg9[%c0_36, %c0_37] : memref<1x512xf32, #tpu.memory_space<vmem>>, vector<1x512xf32>
    %cst_38 = arith.constant dense<0.000000e+00> : vector<8xf32>
    %80 = vector.multi_reduction <add>, %77, %cst_38 [1] : vector<8x512xf32> to vector<8xf32>
    %81 = vector.shape_cast %80 : vector<8xf32> to vector<8x1xf32>
    %cst_39 = arith.constant 5.120000e+02 : f32
    %82 = vector.broadcast %cst_39 : f32 to vector<8x1xf32>
    %83 = arith.divf %81, %82 : vector<8x1xf32>
    %84 = vector.broadcast %83 : vector<8x1xf32> to vector<8x512xf32>
    %85 = arith.subf %77, %84 : vector<8x512xf32>
    %86 = arith.mulf %85, %85 : vector<8x512xf32>
    %cst_40 = arith.constant dense<0.000000e+00> : vector<8xf32>
    %87 = vector.multi_reduction <add>, %86, %cst_40 [1] : vector<8x512xf32> to vector<8xf32>
    %88 = vector.shape_cast %87 : vector<8xf32> to vector<8x1xf32>
    %cst_41 = arith.constant 5.120000e+02 : f32
    %89 = vector.broadcast %cst_41 : f32 to vector<8x1xf32>
    %90 = arith.divf %88, %89 : vector<8x1xf32>
    %91 = vector.broadcast %83 : vector<8x1xf32> to vector<8x512xf32>
    %92 = arith.subf %77, %91 : vector<8x512xf32>
    %cst_42 = arith.constant 9.99999974E-6 : f32
    %93 = vector.broadcast %cst_42 : f32 to vector<8x1xf32>
    %94 = arith.addf %90, %93 : vector<8x1xf32>
    %95 = math.rsqrt %94 : vector<8x1xf32>
    %96 = vector.broadcast %95 : vector<8x1xf32> to vector<8x512xf32>
    %97 = arith.mulf %92, %96 : vector<8x512xf32>
    %98 = vector.broadcast %78 : vector<1x512xf32> to vector<8x512xf32>
    %99 = arith.mulf %97, %98 : vector<8x512xf32>
    %100 = vector.broadcast %79 : vector<1x512xf32> to vector<8x512xf32>
    %101 = arith.addf %99, %100 : vector<8x512xf32>
    %cst_43 = arith.constant 5.000000e-01 : f32
    %102 = vector.broadcast %cst_43 : f32 to vector<8x512xf32>
    %103 = arith.mulf %102, %101 : vector<8x512xf32>
    %cst_44 = arith.constant 0.707106769 : f32
    %104 = vector.broadcast %cst_44 : f32 to vector<8x512xf32>
    %105 = arith.mulf %101, %104 : vector<8x512xf32>
    %106 = math.absf %105 : vector<8x512xf32>
    %cst_45 = arith.constant 0.327591091 : f32
    %107 = vector.broadcast %cst_45 : f32 to vector<8x512xf32>
    %108 = arith.mulf %107, %106 : vector<8x512xf32>
    %cst_46 = arith.constant 1.000000e+00 : f32
    %109 = vector.broadcast %cst_46 : f32 to vector<8x512xf32>
    %110 = arith.addf %109, %108 : vector<8x512xf32>
    %cst_47 = arith.constant 1.000000e+00 : f32
    %111 = vector.broadcast %cst_47 : f32 to vector<8x512xf32>
    %112 = arith.divf %111, %110 : vector<8x512xf32>
    %cst_48 = arith.constant 1.06140542 : f32
    %113 = vector.broadcast %cst_48 : f32 to vector<8x512xf32>
    %114 = arith.mulf %113, %112 : vector<8x512xf32>
    %cst_49 = arith.constant -1.45315206 : f32
    %115 = vector.broadcast %cst_49 : f32 to vector<8x512xf32>
    %116 = arith.addf %114, %115 : vector<8x512xf32>
    %117 = arith.mulf %116, %112 : vector<8x512xf32>
    %cst_50 = arith.constant 1.42141378 : f32
    %118 = vector.broadcast %cst_50 : f32 to vector<8x512xf32>
    %119 = arith.addf %117, %118 : vector<8x512xf32>
    %120 = arith.mulf %119, %112 : vector<8x512xf32>
    %cst_51 = arith.constant -0.284496725 : f32
    %121 = vector.broadcast %cst_51 : f32 to vector<8x512xf32>
    %122 = arith.addf %120, %121 : vector<8x512xf32>
    %123 = arith.mulf %122, %112 : vector<8x512xf32>
    %cst_52 = arith.constant 0.254829586 : f32
    %124 = vector.broadcast %cst_52 : f32 to vector<8x512xf32>
    %125 = arith.addf %123, %124 : vector<8x512xf32>
    %126 = arith.mulf %125, %112 : vector<8x512xf32>
    %127 = arith.mulf %106, %106 : vector<8x512xf32>
    %cst_53 = arith.constant 0.000000e+00 : f32
    %128 = vector.broadcast %cst_53 : f32 to vector<8x512xf32>
    %129 = arith.subf %128, %127 : vector<8x512xf32>
    %130 = math.exp %129 : vector<8x512xf32>
    %131 = arith.mulf %126, %130 : vector<8x512xf32>
    %cst_54 = arith.constant 1.000000e+00 : f32
    %132 = vector.broadcast %cst_54 : f32 to vector<8x512xf32>
    %133 = arith.subf %132, %131 : vector<8x512xf32>
    %cst_55 = arith.constant 0.000000e+00 : f32
    %134 = vector.broadcast %cst_55 : f32 to vector<8x512xf32>
    %135 = arith.cmpf olt, %105, %134 : vector<8x512xf32>
    %cst_56 = arith.constant 0.000000e+00 : f32
    %136 = vector.broadcast %cst_56 : f32 to vector<8x512xf32>
    %137 = arith.subf %136, %133 : vector<8x512xf32>
    %138 = arith.select %135, %137, %133 : vector<8x512xi1>, vector<8x512xf32>
    %cst_57 = arith.constant 1.000000e+00 : f32
    %139 = vector.broadcast %cst_57 : f32 to vector<8x512xf32>
    %140 = arith.addf %139, %138 : vector<8x512xf32>
    %141 = arith.mulf %103, %140 : vector<8x512xf32>
    %142 = arith.addf %141, %76 : vector<8x512xf32>
    %c0_58 = arith.constant 0 : index
    %c0_59 = arith.constant 0 : index
    %143 = vector.load %arg10[%c0_58, %c0_59] : memref<8x512xf32, #tpu.memory_space<vmem>>, vector<8x512xf32>
    tpu.vector_store %arg10[%c0_58, %c0_59], %142 {strides = array<i32>} : memref<8x512xf32, #tpu.memory_space<vmem>>, vector<8x512xf32>,
    return
  }
  func.func @transform_0(%arg0: i32) -> (i32, i32) {
    %c0_i32 = arith.constant 0 : i32
    %c0_i32_0 = arith.constant 0 : i32
    return %arg0, %c0_i32 : i32, i32
  }
  func.func @transform_1(%arg0: i32) -> (i32, i32) {
    %c0_i32 = arith.constant 0 : i32
    %c0_i32_0 = arith.constant 0 : i32
    %c0_i32_1 = arith.constant 0 : i32
    return %c0_i32, %c0_i32_0 : i32, i32
  }
  func.func @transform_2(%arg0: i32) -> (i32, i32) {
    %c0_i32 = arith.constant 0 : i32
    %c0_i32_0 = arith.constant 0 : i32
    %c0_i32_1 = arith.constant 0 : i32
    return %c0_i32, %c0_i32_0 : i32, i32
  }
  func.func @transform_3(%arg0: i32) -> (i32, i32) {
    %c0_i32 = arith.constant 0 : i32
    %c0_i32_0 = arith.constant 0 : i32
    %c0_i32_1 = arith.constant 0 : i32
    return %c0_i32, %c0_i32_0 : i32, i32
  }
  func.func @transform_4(%arg0: i32) -> (i32, i32) {
    %c0_i32 = arith.constant 0 : i32
    %c0_i32_0 = arith.constant 0 : i32
    %c0_i32_1 = arith.constant 0 : i32
    return %c0_i32, %c0_i32_0 : i32, i32
  }
  func.func @transform_5(%arg0: i32) -> (i32, i32) {
    %c0_i32 = arith.constant 0 : i32
    %c0_i32_0 = arith.constant 0 : i32
    %c0_i32_1 = arith.constant 0 : i32
    return %c0_i32, %c0_i32_0 : i32, i32
  }
  func.func @transform_6(%arg0: i32) -> (i32, i32) {
    %c0_i32 = arith.constant 0 : i32
    %c0_i32_0 = arith.constant 0 : i32
    %c0_i32_1 = arith.constant 0 : i32
    return %c0_i32, %c0_i32_0 : i32, i32
  }
  func.func @transform_7(%arg0: i32) -> (i32, i32) {
    %c0_i32 = arith.constant 0 : i32
    %c0_i32_0 = arith.constant 0 : i32
    %c0_i32_1 = arith.constant 0 : i32
    return %c0_i32, %c0_i32_0 : i32, i32
  }
  func.func @transform_8(%arg0: i32) -> (i32, i32) {
    %c0_i32 = arith.constant 0 : i32
    %c0_i32_0 = arith.constant 0 : i32
    %c0_i32_1 = arith.constant 0 : i32
    return %c0_i32, %c0_i32_0 : i32, i32
  }
  func.func @transform_9(%arg0: i32) -> (i32, i32) {
    %c0_i32 = arith.constant 0 : i32
    %c0_i32_0 = arith.constant 0 : i32
    return %arg0, %c0_i32 : i32, i32
  }
}

</mosaic_0001>

<bundles_post_ra>
// kernel: feature_extractor.1
= control target key start
LH: loop header
LB: loop body
LE: loop exit
PB: predicated region body
PF: predicated region fallthrough
CT: control target
= control target key end

     0   :  { %14 = vsyncpa [#allocation3], 0  ;;  %s2669_s0 = inlined_call_operand.vmem [shape: f32[16,5], index: 0, kind: input, shape index: {}]   ;;  %s2670_s1 = inlined_call_operand.vmem [shape: f32[5,256], index: 1, kind: input, shape index: {}]   ;;  %s2671_s2 = inlined_call_operand.hbm [shape: f32[1,256], index: 2, kind: input, shape index: {}]   ;;  %s2672_s3 = inlined_call_operand.hbm [shape: f32[1,256], index: 3, kind: input, shape index: {}]   ;;  %s2673_s4 = inlined_call_operand.hbm [shape: f32[1,256], index: 4, kind: input, shape index: {}]   ;;  %s2674_s5 = inlined_call_operand.hbm [shape: bf16[256,1024], index: 5, kind: input, shape index: {}]   ;;  %s2675_s6 = inlined_call_operand.vmem [shape: f32[1,1024], index: 6, kind: input, shape index: {}]   ;;  %s2676_s7 = inlined_call_operand.vmem [shape: f32[1,512], index: 7, kind: input, shape index: {}]   ;;  %s2677_s8 = inlined_call_operand.vmem [shape: f32[1,512], index: 8, kind: input, shape index: {}]   ;;  %s2678_s9 = inlined_call_operand.hbm [shape: f32[16,512], index: 9, kind: output, shape index: {}]  }
   0x1   :  { %15 = vsyncpa [#allocation6], 0 }
   0x2   :  { %16 = vsyncpa [#allocation9], 0 }
   0x3   :  { %17 = vsyncpa [#allocation4], 0 }
   0x4   :  { %19 = vsyncpa [#allocation4 + $0x1], 0  ;;  %s2361_s30 = smov 0   ;;  %s2363_s10 = smov 0  }
   0x5   :  { %s2365_s11 = smov 0   ;;  %s2367_s12 = smov 0  }
   0x6 LB: > { %s2382_s13 = sadd.s32 4294967295, %s2301_s12   ;;  %s1863_s14 = sadd.s32 4294967294, %s2301_s12   ;;  %s2301_s12 = sphi %s2367_s12, %s2698_s12   ;;  %s2297_s11 = sphi %s2365_s11, %s2697_s11   ;;  %s2293_s10 = sphi %s2363_s10, %s2696_s10   ;;  %s2289_s30 = sphi %s2361_s30, %s2695_s30  }
   0x7   : > { %s2386_s15 = sadd.s32 1, %s2301_s12   ;;  %s226_s16 = sadd.s32 1, %s2297_s11 }
   0x8   : > { %s223_s17 = ssub.s32 %s2301_s12, %s2386_s15  ;;  %p236_p0 = scmp.ne.s32.totalorder %s2297_s11, %s2293_s10 }
   0x9   : > { %p224_p1 = scmp.eq.s32.totalorder %s223_s17, 0  ;;  %p237_p2 = scmp.eq.s32.totalorder %s2382_s13, 1 }
   0xa   : > { %p242_p3 = scmp.ne.s32.totalorder %s2293_s10, %s2289_s30  ;;  %p243_p4 = scmp.eq.s32.totalorder %s1863_s14, 1 }
   0xb   : > { %s2397_s18 = scalar_select %p224_p1, %s2297_s11, %s226_s16  }
   0xc   : > { %p2399_p5 = por %p237_p2, %p236_p0  ;;  %p2403_p6 = por %p243_p4, %p242_p3 }
   0xd   : > { %p1864_p7 = scmp.ge.s32.totalorder %s2301_s12, 1  ;;  %p250_p8 = scmp.lt.s32.totalorder %s2301_s12, 3 }
   0xe   : > { %s2682_s19 = scalar_select %p2399_p5, 1, 0 }
   0xf   : > { %s2683_s20 = scalar_select %p2403_p6, 1, 0 }
  0x10   : > { %p2679_p9 = scmp.eq.s32.totalorder %s2382_s13, 0  ;;  %p2410_p10 = pnand %p1864_p7, %p250_p8 }
  0x11   : > { %s2303_s22 = smov [#allocation5]   ;;  %s2304_s24 = smov [#allocation2]  }
  0x12   : > { %s2684_s21 = scalar_select %p2410_p10, 1, 0 }
  0x13   : > { %s277_s23 = sshll.u32 %s2303_s22, 4  ;;  %p2032_p11 = pneg %p2410_p10  ;;  %s278_s23 = int_to_ptr.vmem [resolvable:$true] %s277_s23 }
  0x14   : > { %s266_s25 = sshll.u32 %s2304_s24, 4  ;;  %s2305_s27 = smov [#allocation7]   ;;  %s267_s25 = int_to_ptr.vmem [resolvable:$true] %s266_s25 }
  0x15   : > { %p2418_p12 = pnand %p2679_p9, %p2032_p11  ;;  %s288_s28 = sshll.u32 %s2305_s27, 4  ;;  %s2422_s28 = int_to_ptr.vmem [resolvable:$true] %s288_s28 }
  0x16   : > { %s2136_s29 = scalar_lea.vmem %s278_s23, 32  ;;  %p2144_p3 = scmp.lt.s32.totalorder %s278_s23, %s278_s23 }
  0x17   : > { %p2127_p13 = pneg %p2418_p12  ;;  %p2137_p0 = scmp.ne.s32.totalorder %s278_s23, %s2136_s29 }
  0x18   : > { %p2145_p4 = scmp.lt.s32.totalorder %s2136_s29, %s2136_s29 }
  0x19   : > { %p2139_p1 = pnand %p2137_p0, %p2127_p13 }
  0x1a   : > { %p2146_p7 = por %p2145_p4, %p2144_p3 }
  0x1b   : > { %p2140_p2 = pneg %p2139_p1 }
  0x1d   : > { %p2147_p8 = pnand %p2146_p7, %p2140_p2 }
  0x1f   : > { %2150 = shalt.err (!%p2147_p8)
}
  0x20   : > { %2038 = dma.hbm_to_vmem [thread:$0]  (!%p2418_p12), %s2672_s3, 32, %s278_s23, [#allocation6]  }
  0x21   : > { %s2162_s17 = scalar_lea.vmem %s267_s25, 32  ;;  %p2170_p0 = scmp.lt.s32.totalorder %s267_s25, %s267_s25 }
  0x22   : > { %p2163_p11 = scmp.ne.s32.totalorder %s267_s25, %s2162_s17  ;;  %p2171_p1 = scmp.lt.s32.totalorder %s2162_s17, %s2162_s17 }
  0x24   : > { %p2165_p9 = pnand %p2163_p11, %p2127_p13  ;;  %p2172_p5 = por %p2171_p1, %p2170_p0 }
  0x26   : > { %p2166_p6 = pneg %p2165_p9 }
  0x28   : > { %p2173_p10 = pnand %p2172_p5, %p2166_p6 }
  0x2a   : > { %2176 = shalt.err (!%p2173_p10)
}
  0x2b   : > { %2035 = dma.hbm_to_vmem [thread:$0]  (!%p2418_p12), %s2671_s2, 32, %s267_s25, [#allocation3]  }
  0x2c   : > { %s2188_s23 = scalar_lea.vmem %s2422_s28, 32  ;;  %p2196_p4 = scmp.lt.s32.totalorder %s2422_s28, %s2422_s28 }
  0x2d   : > { %p2189_p2 = scmp.ne.s32.totalorder %s2422_s28, %s2188_s23  ;;  %p2197_p5 = scmp.lt.s32.totalorder %s2188_s23, %s2188_s23 }
  0x2f   : > { %p2191_p9 = pnand %p2189_p2, %p2127_p13  ;;  %p2198_p6 = por %p2197_p5, %p2196_p4 }
  0x31   : > { %p2192_p3 = pneg %p2191_p9 }
  0x33   : > { %p2199_p10 = pnand %p2198_p6, %p2192_p3 }
  0x35   : > { %2202 = shalt.err (!%p2199_p10)
}
  0x36   : > { %2041 = dma.hbm_to_vmem [thread:$0]  (!%p2418_p12), %s2673_s4, 32, %s2422_s28, [#allocation6]  }
  0x37   : > { %s2306_s25 = smov [#allocation8]  }
  0x38   : > { %s298_s14 = sshll.u32 %s2306_s25, 4  ;;  %s299_s14 = int_to_ptr.vmem [resolvable:$true] %s298_s14 }
  0x39   : > { %s2214_s16 = scalar_lea.vmem %s299_s14, 16384  ;;  %p2222_p0 = scmp.lt.s32.totalorder %s299_s14, %s299_s14 }
  0x3a   : > { %p2215_p7 = scmp.ne.s32.totalorder %s299_s14, %s2214_s16  ;;  %p2223_p1 = scmp.lt.s32.totalorder %s2214_s16, %s2214_s16 }
  0x3c   : > { %p2217_p8 = pnand %p2215_p7, %p2127_p13  ;;  %p2224_p2 = por %p2223_p1, %p2222_p0 }
  0x3e   : > { %p2218_p11 = pneg %p2217_p8 }
  0x40   : > { %p2225_p9 = pnand %p2224_p2, %p2218_p11 }
  0x42   : > { %2228 = shalt.err (!%p2225_p9)
}
  0x43   : > { %s2307_s17 = smov 512   ;;  %s2308_s22 = smov 32  }
  0x44   : > { %2044 = dma.hbm_to_vmem [thread:$0]  (!%p2418_p12), %s2674_s5, 16384, %s299_s14, [#allocation9], %s2307_s17, %s2307_s17, %s2308_s22  }
  0x45   : > { %p2686_p3 = scmp.ne.s32.totalorder %s2684_s21, 0 }
  0x46   : > { %p2687_p4 = scmp.eq.s32.totalorder (!%p2686_p3), %s2382_s13, 0 }
  0x47   : > { %330 = sbr.rel (%p2686_p3) target bundleno = 1299 (0x513), region = 56 }
  0x4c   : > { %2272 = dma.done.wait (%p2687_p4), [#allocation3], 32   ;;  %p2688_p13 = pmov %p2687_p4 }
  0x4d   : > { %p2689_p5 = pmov %p2687_p4 }
  0x4e   : > { %2274 = vsyncadd (%p2688_p13), [#allocation3], 4294967264 }
  0x4f   : > { %2276 = dma.done.wait (%p2689_p5), [#allocation6], 64   ;;  %p2690_p6 = pmov %p2687_p4 }
  0x50   : > { %p2691_p10 = pmov %p2687_p4 }
  0x51   : > { %2278 = vsyncadd (%p2690_p6), [#allocation6], 4294967232 }
  0x52   : > { %2280 = dma.done.wait (%p2691_p10), [#allocation9], 16384   ;;  %p2692_p12 = pmov %p2687_p4 }
  0x53   : > { %p377_p7 = scmp.lt.s32.totalorder %s2382_s13, 1  ;;  %v2309_v0 = vmov 0.0   ;;  %vm400_vm0 = vcmask 1044480   ;;  %v383_v1 = vld [vmem:[%s2670_s1 + $0x8] sm:$0x1f]  ;;  %vm396_vm1 = vcmask 39936   ;;  %v386_v4 = vlaneseq }
  0x54   : > { %2282 = vsyncadd (%p2692_p12), [#allocation9], 4294950912  ;;  %471 = vmatprep.mubr.f32.mxu0 %v2309_v0  ;;  %v382_v2 = vld [vmem:[%s2670_s1] sm:$0x1f]  ;;  %1877 = vmatprep.subr.msk.mxu0 %vm400_vm0, %v383_v1  ;;  %v635_v23 = vld [vmem:[#allocation8 + $0x1c0] sm:$0xff]  ;;  %s374_s27 = sand.u32 1, %s2293_s10  }
  0x55   : > { %s378_s21 = scalar_select %p377_p7, %s2382_s13, 1  ;;  %1878 = vmatpush1.msk.msra.mxu0 %vm400_vm0, %v382_v2  ;;  %v2488_v5 = vshrl.u32 %v386_v4, 7  ;;  %v384_v8 = vld [vmem:[#allocation2] sm:$0x3]  ;;  %v639_v24 = vld [vmem:[#allocation8 + $0x1e0] sm:$0xff]  ;;  %v636_v25 = vld [vmem:[#allocation8 + $0x1c8] sm:$0xff] }
  0x56   : > { %v1937_v26 = vcombine.high %v635_v23, %v639_v24  ;;  %v640_v27 = vld [vmem:[#allocation8 + $0x1e8] sm:$0xff]  ;;  %v1936_v30 = vcombine.low %v635_v23, %v639_v24  ;;  %v627_v31 = vld [vmem:[#allocation8 + $0x180] sm:$0xff]  ;;  %s2013_s25 = sshll.u32 %s2382_s13, 9  ;;  %s1749_s13 = scalar_lea.sflag [#allocation4], %s374_s27 }
  0x57   : > { %s1876_s26 = sshll.u32 %s378_s21, 3  ;;  %v2491_v6 = vsub.s32 0, %v2488_v5  ;;  %v2494_v7 = vsub.s32 1, %v2488_v5  ;;  %v1938_v28 = vcombine.low %v636_v25, %v640_v27  ;;  %v1939_v29 = vcombine.high %v636_v25, %v640_v27  ;;  %v631_v32 = vld [vmem:[#allocation8 + $0x1a0] sm:$0xff]  ;;  %v628_v33 = vld [vmem:[#allocation8 + $0x188] sm:$0xff]  ;;  %s2632_s24 = scalar_lea.hbm %s2678_s9, %s2013_s25 }
  0x58   : > { %s380_s29 = scalar_lea.vmem %s2669_s0, %s1876_s26  ;;  %1389 = vmatprep.subr.bf16.mxu1 %v1937_v26  ;;  %v1929_v34 = vcombine.high %v627_v31, %v631_v32  ;;  %v632_v35 = vld [vmem:[#allocation8 + $0x1a8] sm:$0xff]  ;;  %v1928_v38 = vcombine.low %v627_v31, %v631_v32  ;;  %v619_v39 = vld [vmem:[#allocation8 + $0x140] sm:$0xff]  ;;  %p2693_p11 = scmp.ne.s32.totalorder %s2682_s19, 0 }
  0x59   : > { %v381_v3 = vld [vmem:[%s380_s29] sm:$0xff]  ;;  %v389_v9 = vrot.slane %v384_v8, %v2491_v6  ;;  %v393_v10 = vrot.slane %v384_v8, %v2494_v7  ;;  %1430 = vmatprep.subr.bf16.mxu0 %v1939_v29  ;;  %1390 = vmatpush1.bf16.msra.mxu1 %v1936_v30  ;;  %v1930_v36 = vcombine.low %v628_v33, %v632_v35  ;;  %v620_v41 = vld [vmem:[#allocation8 + $0x148] sm:$0xff]  ;;  %s1875_s29 = sshll.u32 %s374_s27, 5  ;;  %s2310_s21 = smov [#allocation10]  }
  0x5a   : > { %1879 = vmatmul.mubr.msk.f32.vlgmr.msra.gmra.mxu0 %vm396_vm1, %v381_v3  ;;  %v1931_v37 = vcombine.high %v628_v33, %v632_v35  ;;  %1391 = vmatprep.subr.bf16.mxu1 %v1929_v34  ;;  %v623_v40 = vld [vmem:[#allocation8 + $0x160] sm:$0xff]  ;;  %v624_v43 = vld [vmem:[#allocation8 + $0x168] sm:$0xff]  ;;  %s376_s14 = scalar_lea.vmem [#allocation10], %s1875_s29  ;;  %s2233_s26 = sshll.u32 %s2310_s21, 4  ;;  %s2234_s26 = int_to_ptr.vmem [resolvable:$false] %s2233_s26 }
  0x5b   : > { %1431 = vmatpush1.bf16.msra.mxu0 %v1938_v28  ;;  %v1921_v42 = vcombine.high %v619_v39, %v623_v40  ;;  %v1920_v44 = vcombine.low %v619_v39, %v623_v40  ;;  %v611_v45 = vld [vmem:[#allocation8 + $0x100] sm:$0xff]  ;;  %v1922_v47 = vcombine.low %v620_v41, %v624_v43  ;;  %v1923_v48 = vcombine.high %v620_v41, %v624_v43  ;;  %v612_v50 = vld [vmem:[#allocation8 + $0x108] sm:$0xff]  ;;  %s1763_s16 = sshll.u32 %s376_s14, 4  ;;  %s2235_s23 = scalar_lea.vmem %s2234_s26, 1024  ;;  %s1764_s16 = int_to_ptr.vmem [resolvable:$true] %s1763_s16 }
  0x5c   : > { %1432 = vmatprep.subr.bf16.mxu0 %v1931_v37  ;;  %v615_v46 = vld [vmem:[#allocation8 + $0x120] sm:$0xff]  ;;  %v616_v51 = vld [vmem:[#allocation8 + $0x128] sm:$0xff]  ;;  %s2229_s28 = scalar_lea.vmem %s1764_s16, 512  ;;  %p2236_p2 = scmp.lt.s32.totalorder %s1764_s16, %s2234_s26 }
  0x5d   : > { %1392 = vmatpush1.bf16.msra.mxu1 %v1928_v38  ;;  %v1913_v49 = vcombine.high %v611_v45, %v615_v46  ;;  %v603_v52 = vld [vmem:[#allocation8 + $0xc0] sm:$0xff]  ;;  %v1915_v53 = vcombine.high %v612_v50, %v616_v51  ;;  %v604_v55 = vld [vmem:[#allocation8 + $0xc8] sm:$0xff]  ;;  %v1912_v57 = vcombine.low %v611_v45, %v615_v46  ;;  %v1914_v58 = vcombine.low %v612_v50, %v616_v51  ;;  %p2230_p8 = scmp.ne.s32.totalorder %s1764_s16, %s2229_s28  ;;  %p2237_p9 = scmp.lt.s32.totalorder %s2235_s23, %s2229_s28 }
  0x5e   : > { %1393 = vmatprep.subr.bf16.mxu1 %v1921_v42  ;;  %v607_v54 = vld [vmem:[#allocation8 + $0xe0] sm:$0xff]  ;;  %v608_v56 = vld [vmem:[#allocation8 + $0xe8] sm:$0xff] }
  0x5f   : > { %1433 = vmatpush1.bf16.msra.mxu0 %v1930_v36  ;;  %v1905_v59 = vcombine.high %v603_v52, %v607_v54  ;;  %v1907_v60 = vcombine.high %v604_v55, %v608_v56  ;;  %v595_v61 = vld [vmem:[#allocation8 + $0x80] sm:$0xff]  ;;  %v596_v63 = vld [vmem:[#allocation8 + $0x88] sm:$0xff]  ;;  %v1904_v1 = vcombine.low %v603_v52, %v607_v54  ;;  %v1906_v2 = vcombine.low %v604_v55, %v608_v56  ;;  %p2231_p0 = pnand %p2230_p8, %p2693_p11  ;;  %p2238_p3 = por %p2237_p9, %p2236_p2 }
  0x60   : > { %1434 = vmatprep.subr.bf16.mxu0 %v1923_v48  ;;  %v599_v62 = vld [vmem:[#allocation8 + $0xa0] sm:$0xff]  ;;  %v600_v0 = vld [vmem:[#allocation8 + $0xa8] sm:$0xff] }
  0x61   : > { %1394 = vmatpush1.bf16.msra.mxu1 %v1920_v44  ;;  %v1897_v3 = vcombine.high %v595_v61, %v599_v62  ;;  %v1899_v4 = vcombine.high %v596_v63, %v600_v0  ;;  %v587_v8 = vld [vmem:[#allocation8 + $0x40] sm:$0xff]  ;;  %v700_v28 = vld [vmem:[#allocation8 + $0x3c8] sm:$0xff]  ;;  %p2232_p1 = pneg %p2231_p0 }
  0x62   : > { %1395 = vmatprep.subr.bf16.mxu1 %v1913_v49  ;;  %v699_v26 = vld [vmem:[#allocation8 + $0x3c0] sm:$0xff]  ;;  %v704_v29 = vld [vmem:[#allocation8 + $0x3e8] sm:$0xff] }
  0x63   : > { %1435 = vmatpush1.bf16.msra.mxu0 %v1922_v47  ;;  %v703_v27 = vld [vmem:[#allocation8 + $0x3e0] sm:$0xff]  ;;  %v2003_v33 = vcombine.high %v700_v28, %v704_v29  ;;  %v692_v36 = vld [vmem:[#allocation8 + $0x388] sm:$0xff]  ;;  %v2002_v39 = vcombine.low %v700_v28, %v704_v29  ;;  %p2239_p4 = pnand %p2238_p3, %p2232_p1 }
  0x64   : > { %1436 = vmatprep.subr.bf16.mxu0 %v1915_v53  ;;  %v2001_v32 = vcombine.high %v699_v26, %v703_v27  ;;  %v691_v34 = vld [vmem:[#allocation8 + $0x380] sm:$0xff]  ;;  %v696_v37 = vld [vmem:[#allocation8 + $0x3a8] sm:$0xff]  ;;  %v2000_v38 = vcombine.low %v699_v26, %v703_v27 }
  0x65   : > { %1396 = vmatpush1.bf16.msra.mxu1 %v1912_v57  ;;  %v695_v35 = vld [vmem:[#allocation8 + $0x3a0] sm:$0xff]  ;;  %v1995_v41 = vcombine.high %v692_v36, %v696_v37  ;;  %v684_v44 = vld [vmem:[#allocation8 + $0x348] sm:$0xff]  ;;  %v1994_v47 = vcombine.low %v692_v36, %v696_v37  ;;  %v2514_v37 = vld [vmem:[#allocation8 + $0x1f8] sm:$0xff] }
  0x66   : > { %1397 = vmatprep.subr.bf16.mxu1 %v1905_v59  ;;  %v1993_v40 = vcombine.high %v691_v34, %v695_v35  ;;  %v683_v42 = vld [vmem:[#allocation8 + $0x340] sm:$0xff]  ;;  %v688_v45 = vld [vmem:[#allocation8 + $0x368] sm:$0xff]  ;;  %v1992_v46 = vcombine.low %v691_v34, %v695_v35  ;;  %v2508_v34 = vld [vmem:[#allocation8 + $0x1f0] sm:$0xff] }
  0x67   : > { %1437 = vmatpush1.bf16.msra.mxu0 %v1914_v58  ;;  %v687_v43 = vld [vmem:[#allocation8 + $0x360] sm:$0xff]  ;;  %v1987_v49 = vcombine.high %v684_v44, %v688_v45  ;;  %v676_v52 = vld [vmem:[#allocation8 + $0x308] sm:$0xff]  ;;  %v1986_v55 = vcombine.low %v684_v44, %v688_v45  ;;  %v2510_v35 = vld [vmem:[#allocation8 + $0x1d8] sm:$0xff] }
  0x68   : > { %1438 = vmatprep.subr.bf16.mxu0 %v1907_v60  ;;  %v1985_v48 = vcombine.high %v683_v42, %v687_v43  ;;  %v675_v50 = vld [vmem:[#allocation8 + $0x300] sm:$0xff]  ;;  %v680_v53 = vld [vmem:[#allocation8 + $0x328] sm:$0xff]  ;;  %v1984_v54 = vcombine.low %v683_v42, %v687_v43  ;;  %v478_v44 = vld [vmem:[#allocation5] sm:$0x3] }
  0x69   : > { %1398 = vmatpush1.bf16.msra.mxu1 %v1904_v1  ;;  %v679_v51 = vld [vmem:[#allocation8 + $0x320] sm:$0xff]  ;;  %v1979_v57 = vcombine.high %v676_v52, %v680_v53  ;;  %v668_v60 = vld [vmem:[#allocation8 + $0x2c8] sm:$0xff]  ;;  %v479_v45 = vld [vmem:[#allocation7] sm:$0x3] }
  0x6a   : > { %1399 = vmatprep.subr.bf16.mxu1 %v1897_v3  ;;  %v1977_v56 = vcombine.high %v675_v50, %v679_v51  ;;  %v667_v58 = vld [vmem:[#allocation8 + $0x2c0] sm:$0xff]  ;;  %v648_v26 = vld [vmem:[#allocation8 + $0x228] sm:$0xff] }
  0x6b   : > { %1439 = vmatpush1.bf16.msra.mxu0 %v1906_v2  ;;  %v671_v59 = vld [vmem:[#allocation8 + $0x2e0] sm:$0xff] }
  0x6c   : > { %1440 = vmatprep.subr.bf16.mxu0 %v1899_v4  ;;  %v659_v2 = vld [vmem:[#allocation8 + $0x280] sm:$0xff]  ;;  %v660_v4 = vld [vmem:[#allocation8 + $0x288] sm:$0xff] }
  0x6d   : > { %v663_v3 = vld [vmem:[#allocation8 + $0x2a0] sm:$0xff] }
 0x11a   : > { %v473_v11 = vpop.f32.mrf.mxu0 }
 0x11b   : > { %v474_v13 = vadd.f32 %v473_v11, %v389_v9  ;;  %v591_v9 = vld [vmem:[#allocation8 + $0x60] sm:$0xff]  ;;  %v592_v11 = vld [vmem:[#allocation8 + $0x68] sm:$0xff] }
 0x11c   : > { %v475_v12 = vpop.f32.mrf.mxu0 }
 0x11d   : > { %v476_v14 = vadd.f32 %v475_v12, %v393_v10  ;;  %v588_v10 = vld [vmem:[#allocation8 + $0x48] sm:$0xff]  ;;  %v1896_v12 = vcombine.low %v595_v61, %v599_v62  ;;  %v1976_v62 = vcombine.low %v675_v50, %v679_v51  ;;  %v518_v51 = vrot.slane %v479_v45, %v2494_v7 }
 0x11e   : > { %v1890_v23 = vcombine.low %v588_v10, %v592_v11  ;;  %v672_v61 = vld [vmem:[#allocation8 + $0x2e8] sm:$0xff] }
 0x11f   : > { %v480_v15 = vadd.f32 %v476_v14, %v474_v13  ;;  %1400 = vmatpush1.bf16.msra.mxu1 %v1896_v12  ;;  %v1971_v1 = vcombine.high %v668_v60, %v672_v61 }
 0x121   : > { %481 = vadd.xlane.f32.xlu0 %v480_v15  ;;  %v1891_v15 = vcombine.high %v588_v10, %v592_v11  ;;  %v1970_v10 = vcombine.low %v668_v60, %v672_v61  ;;  %v1961_v11 = vcombine.high %v659_v2, %v663_v3 }
 0x1aa   : > { %v482_v16 = vpop.xlane.xlu0 %481 }
 0x1ab   : > { %v484_v17 = vmul.f32 0.00390625, %v482_v16  ;;  %v579_v16 = vld [vmem:[#allocation8] sm:$0xff] }
 0x1ad   : > { %v2498_v18 = vsub.f32 %v474_v13, %v484_v17  ;;  %v2500_v19 = vsub.f32 %v476_v14, %v484_v17  ;;  %v1898_v13 = vcombine.low %v596_v63, %v600_v0  ;;  %v1889_v14 = vcombine.high %v587_v8, %v591_v9  ;;  %v583_v17 = vld [vmem:[#allocation8 + $0x20] sm:$0xff] }
 0x1ae   : > { %v1881_v24 = vcombine.high %v579_v16, %v583_v17  ;;  %v1880_v30 = vcombine.low %v579_v16, %v583_v17  ;;  %v1978_v63 = vcombine.low %v676_v52, %v680_v53  ;;  %v1969_v0 = vcombine.high %v667_v58, %v671_v59  ;;  %v656_v16 = vld [vmem:[#allocation8 + $0x268] sm:$0xff] }
 0x1af   : > { %v487_v20 = vmul.f32 %v2498_v18, %v2498_v18  ;;  %v488_v21 = vmul.f32 %v2500_v19, %v2500_v19  ;;  %1441 = vmatpush1.bf16.msra.mxu0 %v1898_v13  ;;  %1401 = vmatprep.subr.bf16.mxu1 %v1889_v14  ;;  %v651_v13 = vld [vmem:[#allocation8 + $0x240] sm:$0xff]  ;;  %v1960_v17 = vcombine.low %v659_v2, %v663_v3 }
 0x1b0   : > { %1442 = vmatprep.subr.bf16.mxu0 %v1891_v15  ;;  %v655_v14 = vld [vmem:[#allocation8 + $0x260] sm:$0xff]  ;;  %v652_v15 = vld [vmem:[#allocation8 + $0x248] sm:$0xff]  ;;  %v514_v52 = vrot.slane %v479_v45, %v2491_v6 }
 0x1b1   : > { %v489_v22 = vadd.f32 %v488_v21, %v487_v20  ;;  %v580_v20 = vld [vmem:[#allocation8 + $0x8] sm:$0xff]  ;;  %v1952_v27 = vcombine.low %v651_v13, %v655_v14  ;;  %v1954_v28 = vcombine.low %v652_v15, %v656_v16 }
 0x1b2   : > { %v584_v21 = vld [vmem:[#allocation8 + $0x28] sm:$0xff] }
 0x1b3   : > { %490 = vadd.xlane.f32.xlu0 %v489_v22  ;;  %v1888_v22 = vcombine.low %v587_v8, %v591_v9  ;;  %v1883_v25 = vcombine.high %v580_v20, %v584_v21  ;;  %1443 = vmatpush1.bf16.msra.mxu0 %v1890_v23  ;;  %v1882_v31 = vcombine.low %v580_v20, %v584_v21  ;;  %v664_v8 = vld [vmem:[#allocation8 + $0x2a8] sm:$0xff]  ;;  %v643_v23 = vld [vmem:[#allocation8 + $0x200] sm:$0xff] }
 0x1b4   : > { %v1968_v9 = vcombine.low %v667_v58, %v671_v59  ;;  %v1963_v12 = vcombine.high %v660_v4, %v664_v8  ;;  %v1962_v20 = vcombine.low %v660_v4, %v664_v8  ;;  %v1953_v21 = vcombine.high %v651_v13, %v655_v14 }
 0x1b5   : > { %1402 = vmatpush1.bf16.msra.mxu1 %v1888_v22  ;;  %1444 = vmatprep.subr.bf16.mxu0 %v1883_v25  ;;  %v1955_v22 = vcombine.high %v652_v15, %v656_v16  ;;  %v644_v25 = vld [vmem:[#allocation8 + $0x208] sm:$0xff] }
 0x1b6   : > { %1403 = vmatprep.subr.bf16.mxu1 %v1881_v24  ;;  %v647_v24 = vld [vmem:[#allocation8 + $0x220] sm:$0xff] }
 0x1b7   : > { %1445 = vmatpush1.bf16.msra.mxu0 %v1882_v31  ;;  %v1945_v29 = vcombine.high %v643_v23, %v647_v24  ;;  %v1944_v31 = vcombine.low %v643_v23, %v647_v24 }
 0x1b8   : > { %1446 = vmatprep.subr.bf16.mxu0 %v2003_v33  ;;  %v2506_v33 = vld [vmem:[#allocation8 + $0x1d0] sm:$0xff] }
 0x1b9   : > { %1404 = vmatpush1.bf16.msra.mxu1 %v1880_v30  ;;  %v1947_v30 = vcombine.high %v644_v25, %v648_v26  ;;  %v1941_v36 = vcombine.high %v2506_v33, %v2508_v34 }
 0x1ba   : > { %1405 = vmatprep.subr.bf16.mxu1 %v2001_v32  ;;  %v1946_v32 = vcombine.low %v644_v25, %v648_v26 }
 0x1bb   : > { %1447 = vmatpush2.bf16.msra.mxu0 %v2002_v39  ;;  %v1942_v39 = vcombine.low %v2510_v35, %v2514_v37 }
 0x1bc   : > { %1448 = vmatprep.subr.bf16.mxu0 %v1995_v41 }
 0x1bd   : > { %1406 = vmatpush2.bf16.msra.mxu1 %v2000_v38  ;;  %v1940_v38 = vcombine.low %v2506_v33, %v2508_v34 }
 0x1be   : > { %1407 = vmatprep.subr.bf16.mxu1 %v1993_v40  ;;  %v1943_v40 = vcombine.high %v2510_v35, %v2514_v37 }
 0x1bf   : > { %1449 = vmatpush2.bf16.msra.mxu0 %v1994_v47  ;;  %v501_v47 = vrot.slane %v478_v44, %v2491_v6 }
 0x1c0   : > { %1450 = vmatprep.subr.bf16.mxu0 %v1987_v49 }
 0x1c1   : > { %1408 = vmatpush2.bf16.msra.mxu1 %v1992_v46  ;;  %v505_v46 = vrot.slane %v478_v44, %v2494_v7 }
 0x1c2   : > { %1409 = vmatprep.subr.bf16.mxu1 %v1985_v48 }
 0x1c3   : > { %1451 = vmatpush2.bf16.msra.mxu0 %v1986_v55 }
 0x1c4   : > { %1452 = vmatprep.subr.bf16.mxu0 %v1979_v57 }
 0x1c5   : > { %1410 = vmatpush2.bf16.msra.mxu1 %v1984_v54 }
 0x1c6   : > { %1411 = vmatprep.subr.bf16.mxu1 %v1977_v56 }
 0x1c7   : > { %1453 = vmatpush2.bf16.msra.mxu0 %v1978_v63 }
 0x1c8   : > { %1454 = vmatprep.subr.bf16.mxu0 %v1971_v1 }
 0x1c9   : > { %1412 = vmatpush2.bf16.msra.mxu1 %v1976_v62 }
 0x1ca   : > { %1413 = vmatprep.subr.bf16.mxu1 %v1969_v0 }
 0x1cb   : > { %1455 = vmatpush2.bf16.msra.mxu0 %v1970_v10 }
 0x1cc   : > { %1456 = vmatprep.subr.bf16.mxu0 %v1963_v12 }
 0x1cd   : > { %1414 = vmatpush2.bf16.msra.mxu1 %v1968_v9 }
 0x1ce   : > { %1415 = vmatprep.subr.bf16.mxu1 %v1961_v11 }
 0x1cf   : > { %1457 = vmatpush2.bf16.msra.mxu0 %v1962_v20 }
 0x1d0   : > { %1458 = vmatprep.subr.bf16.mxu0 %v1955_v22 }
 0x1d1   : > { %1416 = vmatpush2.bf16.msra.mxu1 %v1960_v17 }
 0x1d2   : > { %1417 = vmatprep.subr.bf16.mxu1 %v1953_v21 }
 0x1d3   : > { %1459 = vmatpush2.bf16.msra.mxu0 %v1954_v28 }
 0x1d4   : > { %1460 = vmatprep.subr.bf16.mxu0 %v1947_v30 }
 0x1d5   : > { %1418 = vmatpush2.bf16.msra.mxu1 %v1952_v27 }
 0x1d6   : > { %1419 = vmatprep.subr.bf16.mxu1 %v1945_v29 }
 0x1d7   : > { %1461 = vmatpush2.bf16.msra.mxu0 %v1946_v32 }
 0x1d8   : > { %1512 = vmatprep.subr.bf16.mxu0 %v1943_v40 }
 0x1d9   : > { %1420 = vmatpush2.bf16.msra.mxu1 %v1944_v31 }
 0x1da   : > { %1471 = vmatprep.subr.bf16.mxu1 %v1941_v36 }
 0x23c   : > { %v491_v41 = vpop.xlane.xlu0 %490 }
 0x23d   : > { %v492_v42 = vmul.f32 0.00390625, %v491_v41 }
 0x23f   : > { %v493_v43 = vadd.f32 1e-05, %v492_v42 }
 0x241   : > { %2097 = vrsqrt.f32 %v493_v43 }
 0x24e   : > { %v2098_v48 = vpop.eup %2097 }
 0x24f   : > { %v495_v49 = vmul.f32 %v2098_v48, %v2498_v18  ;;  %v496_v50 = vmul.f32 %v2098_v48, %v2500_v19 }
 0x251   : > { %v509_v53 = vmul.f32 %v505_v46, %v496_v50  ;;  %v508_v54 = vmul.f32 %v501_v47, %v495_v49 }
 0x253   : > { %v522_v55 = vadd.f32 %v518_v51, %v509_v53  ;;  %v521_v56 = vadd.f32 %v514_v52, %v508_v54  ;;  %v629_v51 = vld [vmem:[#allocation8 + $0x190] sm:$0xff]  ;;  %v630_v54 = vld [vmem:[#allocation8 + $0x198] sm:$0xff] }
 0x254   : > { %v633_v53 = vld [vmem:[#allocation8 + $0x1b0] sm:$0xff] }
 0x255   : > { %v526_v57 = vmul.f32 0.70710677, %v522_v55  ;;  %v525_v58 = vmul.f32 0.70710677, %v521_v56  ;;  %v524_v45 = vmul.f32 0.5, %v522_v55  ;;  %v523_v48 = vmul.f32 0.5, %v521_v56 }
 0x256   : > { %v622_v55 = vld [vmem:[#allocation8 + $0x158] sm:$0xff]  ;;  %v1932_v56 = vcombine.low %v629_v51, %v633_v53 }
 0x257   : > { %v528_v59 = vand.u32 2147483647, %v526_v57  ;;  %v527_v60 = vand.u32 2147483647, %v525_v58  ;;  %vm568_vm2 = vcmp.lt.f32.partialorder %v526_v57, 0.0  ;;  %vm567_vm3 = vcmp.lt.f32.partialorder %v525_v58, 0.0 }
 0x258   : > { %v1933_v57 = vcombine.high %v629_v51, %v633_v53  ;;  %v625_v58 = vld [vmem:[#allocation8 + $0x170] sm:$0xff] }
 0x259   : > { %v530_v61 = vmul.f32 0.3275911, %v528_v59  ;;  %v529_v62 = vmul.f32 0.3275911, %v527_v60  ;;  %v556_v18 = vmul.f32 %v528_v59, %v528_v59  ;;  %v555_v19 = vmul.f32 %v527_v60, %v527_v60  ;;  %v634_v59 = vld [vmem:[#allocation8 + $0x1b8] sm:$0xff] }
 0x25b   : > { %v532_v63 = vadd.f32 1.0, %v530_v61  ;;  %v531_v0 = vadd.f32 1.0, %v529_v62  ;;  %v558_v1 = vsub.f32 0.0, %v556_v18  ;;  %v557_v2 = vsub.f32 0.0, %v555_v19  ;;  %v621_v62 = vld [vmem:[#allocation8 + $0x150] sm:$0xff] }
 0x25c   : > { %v1934_v18 = vcombine.low %v630_v54, %v634_v59  ;;  %v1925_v19 = vcombine.high %v621_v62, %v625_v58  ;;  %v1924_v33 = vcombine.low %v621_v62, %v625_v58  ;;  %v694_v62 = vld [vmem:[#allocation8 + $0x398] sm:$0xff] }
 0x25d   : > { %2099 = vrcp.f32 %v532_v63  ;;  %v561_v9 = vmul.f32 1.442695, %v558_v1  ;;  %v559_v11 = vmul.f32 1.442695, %v557_v2  ;;  %v1935_v63 = vcombine.high %v630_v54, %v634_v59  ;;  %v613_v2 = vld [vmem:[#allocation8 + $0x110] sm:$0xff] }
 0x25e   : > { %2101 = vrcp.f32 %v531_v0  ;;  %v626_v0 = vld [vmem:[#allocation8 + $0x178] sm:$0xff]  ;;  %v693_v59 = vld [vmem:[#allocation8 + $0x390] sm:$0xff] }
 0x25f   : > { %2103 = vpow2.f32 %v561_v9  ;;  %v1927_v1 = vcombine.high %v622_v55, %v626_v0  ;;  %v1926_v34 = vcombine.low %v622_v55, %v626_v0  ;;  %v606_v9 = vld [vmem:[#allocation8 + $0xd8] sm:$0xff] }
 0x260   : > { %2105 = vpow2.f32 %v559_v11 }
 0x26a   : > { %v2100_v3 = vpop.eup %2099 }
 0x26b   : > { %v2102_v4 = vpop.eup %2101  ;;  %v538_v8 = vmul.f32 1.0614054, %v2100_v3 }
 0x26c   : > { %v537_v10 = vmul.f32 1.0614054, %v2102_v4  ;;  %v2104_v29 = vpop.eup %2103 }
 0x26d   : > { %v540_v12 = vadd.f32 -1.4531521, %v538_v8  ;;  %v2106_v31 = vpop.eup %2105  ;;  %v618_v8 = vld [vmem:[#allocation8 + $0x138] sm:$0xff] }
 0x26e   : > { %v539_v13 = vadd.f32 -1.4531521, %v537_v10  ;;  %v610_v10 = vld [vmem:[#allocation8 + $0xf8] sm:$0xff] }
 0x26f   : > { %v542_v14 = vmul.f32 %v2100_v3, %v540_v12 }
 0x270   : > { %v541_v15 = vmul.f32 %v2102_v4, %v539_v13 }
 0x271   : > { %v544_v16 = vadd.f32 1.4214138, %v542_v14  ;;  %v1911_v14 = vcombine.high %v606_v9, %v610_v10 }
 0x272   : > { %v543_v17 = vadd.f32 1.4214138, %v541_v15  ;;  %v597_v15 = vld [vmem:[#allocation8 + $0x90] sm:$0xff] }
 0x273   : > { %v546_v20 = vmul.f32 %v2100_v3, %v544_v16  ;;  %v601_v16 = vld [vmem:[#allocation8 + $0xb0] sm:$0xff] }
 0x274   : > { %v545_v21 = vmul.f32 %v2102_v4, %v543_v17  ;;  %v598_v17 = vld [vmem:[#allocation8 + $0x98] sm:$0xff] }
 0x275   : > { %v548_v22 = vadd.f32 -0.28449672, %v546_v20  ;;  %v602_v20 = vld [vmem:[#allocation8 + $0xb8] sm:$0xff] }
 0x276   : > { %v547_v23 = vadd.f32 -0.28449672, %v545_v21 }
 0x277   : > { %v550_v24 = vmul.f32 %v2100_v3, %v548_v22  ;;  %v1910_v22 = vcombine.low %v606_v9, %v610_v10 }
 0x278   : > { %v549_v25 = vmul.f32 %v2102_v4, %v547_v23  ;;  %v1901_v23 = vcombine.high %v597_v15, %v601_v16 }
 0x279   : > { %v552_v26 = vadd.f32 0.2548296, %v550_v24  ;;  %v1903_v24 = vcombine.high %v598_v17, %v602_v20 }
 0x27a   : > { %v551_v27 = vadd.f32 0.2548296, %v549_v25  ;;  %v589_v25 = vld [vmem:[#allocation8 + $0x50] sm:$0xff] }
 0x27b   : > { %v554_v28 = vmul.f32 %v2100_v3, %v552_v26  ;;  %v617_v3 = vld [vmem:[#allocation8 + $0x130] sm:$0xff] }
 0x27c   : > { %v553_v30 = vmul.f32 %v2102_v4, %v551_v27  ;;  %v614_v4 = vld [vmem:[#allocation8 + $0x118] sm:$0xff]  ;;  %v1917_v35 = vcombine.high %v613_v2, %v617_v3  ;;  %v1916_v11 = vcombine.low %v613_v2, %v617_v3  ;;  %v593_v26 = vld [vmem:[#allocation8 + $0x70] sm:$0xff] }
 0x27d   : > { %v564_v32 = vmul.f32 %v2104_v29, %v554_v28  ;;  %v1919_v37 = vcombine.high %v614_v4, %v618_v8  ;;  %v1918_v12 = vcombine.low %v614_v4, %v618_v8  ;;  %v590_v27 = vld [vmem:[#allocation8 + $0x58] sm:$0xff]  ;;  %v1900_v29 = vcombine.low %v597_v15, %v601_v16 }
 0x27e   : > { %v563_v36 = vmul.f32 %v2106_v31, %v553_v30  ;;  %v594_v28 = vld [vmem:[#allocation8 + $0x78] sm:$0xff]  ;;  %v1902_v30 = vcombine.low %v598_v17, %v602_v20  ;;  %v1893_v31 = vcombine.high %v589_v25, %v593_v26 }
 0x27f   : > { %v566_v40 = vsub.f32 1.0, %v564_v32  ;;  %v1895_v32 = vcombine.high %v590_v27, %v594_v28 }
 0x280   : > { %v565_v41 = vsub.f32 1.0, %v563_v36  ;;  %v581_v36 = vld [vmem:[#allocation8 + $0x10] sm:$0xff] }
 0x281   : > { %v570_v42 = vsub.f32 0.0, %v566_v40 }
 0x282   : > { %v569_v43 = vsub.f32 0.0, %v565_v41 }
 0x283   : > { %v572_v44 = vsel %vm568_vm2, %v570_v42, %v566_v40  ;;  %v585_v40 = vld [vmem:[#allocation8 + $0x30] sm:$0xff]  ;;  %v586_v42 = vld [vmem:[#allocation8 + $0x38] sm:$0xff] }
 0x284   : > { %v574_v46 = vadd.f32 1.0, %v572_v44  ;;  %v571_v47 = vsel %vm567_vm3, %v569_v43, %v565_v41  ;;  %v582_v41 = vld [vmem:[#allocation8 + $0x18] sm:$0xff]  ;;  %v1892_v43 = vcombine.low %v589_v25, %v593_v26  ;;  %v1894_v44 = vcombine.low %v590_v27, %v594_v28 }
 0x285   : > { %v573_v49 = vadd.f32 1.0, %v571_v47  ;;  %v701_v47 = vld [vmem:[#allocation8 + $0x3d0] sm:$0xff]  ;;  %v1884_v51 = vcombine.low %v581_v36, %v585_v40 }
 0x286   : > { %v576_v50 = vmul.f32 %v574_v46, %v524_v45  ;;  %v1885_v45 = vcombine.high %v581_v36, %v585_v40  ;;  %v1887_v46 = vcombine.high %v582_v41, %v586_v42 }
 0x287   : > { %v575_v52 = vmul.f32 %v573_v49, %v523_v48  ;;  %v705_v48 = vld [vmem:[#allocation8 + $0x3f0] sm:$0xff]  ;;  %v702_v49 = vld [vmem:[#allocation8 + $0x3d8] sm:$0xff] }
 0x288   : > { %v578_v60 = vpack.c.bf16 %v576_v50, %v576_v50  ;;  %v706_v50 = vld [vmem:[#allocation8 + $0x3f8] sm:$0xff]  ;;  %v2005_v53 = vcombine.high %v701_v47, %v705_v48 }
 0x289   : > { %v2528_v61 = vpack.c.bf16 %v575_v52, %v575_v52  ;;  %v1886_v52 = vcombine.low %v582_v41, %v586_v42  ;;  %v2007_v54 = vcombine.high %v702_v49, %v706_v50  ;;  %v2006_v58 = vcombine.low %v702_v49, %v706_v50 }
 0x28a   : > { %1421 = vmatprep.mubr.bf16.mxu1 %v578_v60  ;;  %1462 = vmatprep.mubr.bf16.mxu0 %v578_v60 }
 0x28b   : > { %1422 = vmatmul.mubr.bf16.vlgmr.msra.gmra.mxu1 %v2528_v61  ;;  %1463 = vmatmul.mubr.bf16.vlgmr.msra.gmra.mxu0 %v2528_v61 }
 0x28c   : > { %1472 = vmatpush1.bf16.msra.mxu1 %v1940_v38  ;;  %1513 = vmatpush1.bf16.msra.mxu0 %v1942_v39  ;;  %v605_v38 = vld [vmem:[#allocation8 + $0xd0] sm:$0xff] }
 0x28d   : > { %1503 = vmatprep.mubr.bf16.mxu1 %v578_v60  ;;  %1544 = vmatprep.mubr.bf16.mxu0 %v578_v60  ;;  %v609_v39 = vld [vmem:[#allocation8 + $0xf0] sm:$0xff] }
 0x28e   : > { %1473 = vmatprep.subr.bf16.mxu1 %v1933_v57  ;;  %1514 = vmatprep.subr.bf16.mxu0 %v1935_v63  ;;  %v1909_v13 = vcombine.high %v605_v38, %v609_v39  ;;  %v1908_v21 = vcombine.low %v605_v38, %v609_v39  ;;  %v697_v60 = vld [vmem:[#allocation8 + $0x3b0] sm:$0xff]  ;;  %v698_v57 = vld [vmem:[#allocation8 + $0x3b8] sm:$0xff]  ;;  %v2004_v63 = vcombine.low %v701_v47, %v705_v48 }
 0x28f   : > { %v1997_v55 = vcombine.high %v693_v59, %v697_v60  ;;  %v1999_v0 = vcombine.high %v694_v62, %v698_v57  ;;  %v1996_v2 = vcombine.low %v693_v59, %v697_v60  ;;  %v1998_v3 = vcombine.low %v694_v62, %v698_v57 }
 0x290   : > { %1474 = vmatpush1.bf16.msra.mxu1 %v1932_v56  ;;  %1515 = vmatpush1.bf16.msra.mxu0 %v1934_v18  ;;  %v685_v56 = vld [vmem:[#allocation8 + $0x350] sm:$0xff] }
 0x291   : > { %1475 = vmatprep.subr.bf16.mxu1 %v1925_v19  ;;  %1516 = vmatprep.subr.bf16.mxu0 %v1927_v1  ;;  %v689_v18 = vld [vmem:[#allocation8 + $0x370] sm:$0xff]  ;;  %v686_v19 = vld [vmem:[#allocation8 + $0x358] sm:$0xff] }
 0x292   : > { %v690_v1 = vld [vmem:[#allocation8 + $0x378] sm:$0xff]  ;;  %v1989_v4 = vcombine.high %v685_v56, %v689_v18  ;;  %v1988_v38 = vcombine.low %v685_v56, %v689_v18  ;;  %v735_v56 = vsub.s32 6, %v2488_v5 }
 0x293   : > { %v1991_v8 = vcombine.high %v686_v19, %v690_v1  ;;  %v1990_v39 = vcombine.low %v686_v19, %v690_v1  ;;  %v739_v1 = vsub.s32 7, %v2488_v5 }
 0x294   : > { %1476 = vmatpush1.bf16.msra.mxu1 %v1924_v33  ;;  %1517 = vmatpush1.bf16.msra.mxu0 %v1926_v34  ;;  %v677_v33 = vld [vmem:[#allocation8 + $0x310] sm:$0xff] }
 0x295   : > { %1477 = vmatprep.subr.bf16.mxu1 %v1917_v35  ;;  %1518 = vmatprep.subr.bf16.mxu0 %v1919_v37  ;;  %v681_v34 = vld [vmem:[#allocation8 + $0x330] sm:$0xff]  ;;  %v678_v35 = vld [vmem:[#allocation8 + $0x318] sm:$0xff] }
 0x296   : > { %v682_v37 = vld [vmem:[#allocation8 + $0x338] sm:$0xff]  ;;  %v1981_v9 = vcombine.high %v677_v33, %v681_v34  ;;  %v1980_v15 = vcombine.low %v677_v33, %v681_v34 }
 0x297   : > { %v1983_v10 = vcombine.high %v678_v35, %v682_v37  ;;  %v1982_v16 = vcombine.low %v678_v35, %v682_v37 }
 0x298   : > { %1478 = vmatpush1.bf16.msra.mxu1 %v1916_v11  ;;  %1519 = vmatpush1.bf16.msra.mxu0 %v1918_v12  ;;  %v669_v11 = vld [vmem:[#allocation8 + $0x2d0] sm:$0xff] }
 0x299   : > { %1479 = vmatprep.subr.bf16.mxu1 %v1909_v13  ;;  %1520 = vmatprep.subr.bf16.mxu0 %v1911_v14  ;;  %v673_v12 = vld [vmem:[#allocation8 + $0x2f0] sm:$0xff]  ;;  %v670_v13 = vld [vmem:[#allocation8 + $0x2d8] sm:$0xff] }
 0x29a   : > { %v674_v14 = vld [vmem:[#allocation8 + $0x2f8] sm:$0xff]  ;;  %v1973_v17 = vcombine.high %v669_v11, %v673_v12  ;;  %v1972_v25 = vcombine.low %v669_v11, %v673_v12 }
 0x29b   : > { %v1975_v20 = vcombine.high %v670_v13, %v674_v14  ;;  %v1974_v26 = vcombine.low %v670_v13, %v674_v14 }
 0x29c   : > { %1480 = vmatpush1.bf16.msra.mxu1 %v1908_v21  ;;  %1521 = vmatpush1.bf16.msra.mxu0 %v1910_v22  ;;  %v661_v21 = vld [vmem:[#allocation8 + $0x290] sm:$0xff] }
 0x29d   : > { %1481 = vmatprep.subr.bf16.mxu1 %v1901_v23  ;;  %1522 = vmatprep.subr.bf16.mxu0 %v1903_v24  ;;  %v665_v22 = vld [vmem:[#allocation8 + $0x2b0] sm:$0xff]  ;;  %v662_v23 = vld [vmem:[#allocation8 + $0x298] sm:$0xff] }
 0x29e   : > { %v666_v24 = vld [vmem:[#allocation8 + $0x2b8] sm:$0xff]  ;;  %v1965_v27 = vcombine.high %v661_v21, %v665_v22  ;;  %v1964_v36 = vcombine.low %v661_v21, %v665_v22 }
 0x29f   : > { %v1967_v28 = vcombine.high %v662_v23, %v666_v24  ;;  %v1966_v40 = vcombine.low %v662_v23, %v666_v24 }
 0x2a0   : > { %1482 = vmatpush1.bf16.msra.mxu1 %v1900_v29  ;;  %1523 = vmatpush1.bf16.msra.mxu0 %v1902_v30  ;;  %v653_v29 = vld [vmem:[#allocation8 + $0x250] sm:$0xff] }
 0x2a1   : > { %1483 = vmatprep.subr.bf16.mxu1 %v1893_v31  ;;  %1524 = vmatprep.subr.bf16.mxu0 %v1895_v32  ;;  %v657_v30 = vld [vmem:[#allocation8 + $0x270] sm:$0xff]  ;;  %v654_v31 = vld [vmem:[#allocation8 + $0x258] sm:$0xff] }
 0x2a2   : > { %v658_v32 = vld [vmem:[#allocation8 + $0x278] sm:$0xff]  ;;  %v1957_v41 = vcombine.high %v653_v29, %v657_v30  ;;  %v1956_v47 = vcombine.low %v653_v29, %v657_v30 }
 0x2a3   : > { %v1959_v42 = vcombine.high %v654_v31, %v658_v32  ;;  %v1958_v48 = vcombine.low %v654_v31, %v658_v32 }
 0x2a4   : > { %1484 = vmatpush1.bf16.msra.mxu1 %v1892_v43  ;;  %1525 = vmatpush1.bf16.msra.mxu0 %v1894_v44  ;;  %v645_v43 = vld [vmem:[#allocation8 + $0x210] sm:$0xff] }
 0x2a5   : > { %1485 = vmatprep.subr.bf16.mxu1 %v1885_v45  ;;  %1526 = vmatprep.subr.bf16.mxu0 %v1887_v46  ;;  %v649_v44 = vld [vmem:[#allocation8 + $0x230] sm:$0xff]  ;;  %v646_v45 = vld [vmem:[#allocation8 + $0x218] sm:$0xff] }
 0x2a6   : > { %v650_v46 = vld [vmem:[#allocation8 + $0x238] sm:$0xff]  ;;  %v1949_v49 = vcombine.high %v645_v43, %v649_v44 }
 0x2a7   : > { %v1951_v50 = vcombine.high %v646_v45, %v650_v46 }
 0x2a8   : > { %1486 = vmatpush1.bf16.msra.mxu1 %v1884_v51  ;;  %1527 = vmatpush1.bf16.msra.mxu0 %v1886_v52  ;;  %v1948_v51 = vcombine.low %v645_v43, %v649_v44  ;;  %v1950_v52 = vcombine.low %v646_v45, %v650_v46  ;;  %v2571_v43 = vsub.s32 3, %v2488_v5 }
 0x2a9   : > { %1487 = vmatprep.subr.bf16.mxu1 %v2005_v53  ;;  %1528 = vmatprep.subr.bf16.mxu0 %v2007_v54 }
 0x2ac   : > { %1488 = vmatpush2.bf16.msra.mxu1 %v2004_v63  ;;  %1529 = vmatpush2.bf16.msra.mxu0 %v2006_v58 }
 0x2ad   : > { %1489 = vmatprep.subr.bf16.mxu1 %v1997_v55  ;;  %1530 = vmatprep.subr.bf16.mxu0 %v1999_v0  ;;  %v727_v55 = vsub.s32 4, %v2488_v5  ;;  %v731_v0 = vsub.s32 5, %v2488_v5 }
 0x2b0   : > { %1490 = vmatpush2.bf16.msra.mxu1 %v1996_v2  ;;  %1531 = vmatpush2.bf16.msra.mxu0 %v1998_v3 }
 0x2b1   : > { %1491 = vmatprep.subr.bf16.mxu1 %v1989_v4  ;;  %1532 = vmatprep.subr.bf16.mxu0 %v1991_v8 }
 0x2b4   : > { %1492 = vmatpush2.bf16.msra.mxu1 %v1988_v38  ;;  %1533 = vmatpush2.bf16.msra.mxu0 %v1990_v39 }
 0x2b5   : > { %1493 = vmatprep.subr.bf16.mxu1 %v1981_v9  ;;  %1534 = vmatprep.subr.bf16.mxu0 %v1983_v10 }
 0x2b8   : > { %1494 = vmatpush2.bf16.msra.mxu1 %v1980_v15  ;;  %1535 = vmatpush2.bf16.msra.mxu0 %v1982_v16 }
 0x2b9   : > { %1495 = vmatprep.subr.bf16.mxu1 %v1973_v17  ;;  %1536 = vmatprep.subr.bf16.mxu0 %v1975_v20 }
 0x2bc   : > { %1496 = vmatpush2.bf16.msra.mxu1 %v1972_v25  ;;  %1537 = vmatpush2.bf16.msra.mxu0 %v1974_v26 }
 0x2bd   : > { %1497 = vmatprep.subr.bf16.mxu1 %v1965_v27  ;;  %1538 = vmatprep.subr.bf16.mxu0 %v1967_v28 }
 0x2c0   : > { %1498 = vmatpush2.bf16.msra.mxu1 %v1964_v36  ;;  %1539 = vmatpush2.bf16.msra.mxu0 %v1966_v40  ;;  %v1553_v40 = vld [vmem:[%s2676_s7] sm:$0xf] }
 0x2c1   : > { %1499 = vmatprep.subr.bf16.mxu1 %v1957_v41  ;;  %1540 = vmatprep.subr.bf16.mxu0 %v1959_v42  ;;  %v2565_v41 = vsub.s32 2, %v2488_v5  ;;  %v1554_v42 = vld [vmem:[%s2677_s8] sm:$0xf]  ;;  %v1586_v44 = vrot.slane %v1553_v40, %v2491_v6  ;;  %v1590_v45 = vrot.slane %v1553_v40, %v2494_v7 }
 0x2c3   : > { %v1594_v46 = vrot.slane %v1553_v40, %v2565_v41 }
 0x2c4   : > { %1500 = vmatpush2.bf16.msra.mxu1 %v1956_v47  ;;  %1541 = vmatpush2.bf16.msra.mxu0 %v1958_v48  ;;  %v1598_v47 = vrot.slane %v1553_v40, %v2571_v43 }
 0x2c5   : > { %1501 = vmatprep.subr.bf16.mxu1 %v1949_v49  ;;  %1542 = vmatprep.subr.bf16.mxu0 %v1951_v50  ;;  %v1611_v49 = vrot.slane %v1554_v42, %v2491_v6  ;;  %v1615_v50 = vrot.slane %v1554_v42, %v2494_v7 }
 0x2c8   : > { %1502 = vmatpush2.bf16.msra.mxu1 %v1948_v51  ;;  %1543 = vmatpush2.bf16.msra.mxu0 %v1950_v52  ;;  %v1619_v51 = vrot.slane %v1554_v42, %v2565_v41  ;;  %v1623_v52 = vrot.slane %v1554_v42, %v2571_v43 }
 0x2cb   : > { %1504 = vmatmul.mubr.bf16.vlgmr.msra.gmra.mxu1 %v2528_v61  ;;  %1545 = vmatmul.mubr.bf16.vlgmr.msra.gmra.mxu0 %v2528_v61  ;;  %v2554_v61 = vld [vmem:[%s2675_s6] sm:$0xff] }
 0x2cc   : > { %v728_v18 = vrot.slane %v2554_v61, %v727_v55  ;;  %v732_v19 = vrot.slane %v2554_v61, %v731_v0  ;;  %v736_v4 = vrot.slane %v2554_v61, %v735_v56  ;;  %v740_v37 = vrot.slane %v2554_v61, %v739_v1 }
 0x34b   : > { %v2540_v53 = vpop.f32.mrf.mxu1  ;;  %v2542_v54 = vpop.f32.mrf.mxu0 }
 0x34d   : > { %v2544_v59 = vpop.f32.mrf.mxu1  ;;  %v2546_v60 = vpop.f32.mrf.mxu0 }
 0x34f   : > { %v1427_v62 = vpop.f32.mrf.mxu1  ;;  %v1468_v57 = vpop.f32.mrf.mxu0 }
 0x351   : > { %v1428_v63 = vpop.f32.mrf.mxu1  ;;  %v1469_v58 = vpop.f32.mrf.mxu0 }
 0x38b   : > { %v1505_v2 = vpop.f32.mrf.mxu1  ;;  %v1546_v3 = vpop.f32.mrf.mxu0 }
 0x38c   : > { %v1506_v34 = vadd.f32 %v1505_v2, %v728_v18  ;;  %v1547_v9 = vadd.f32 %v1546_v3, %v736_v4 }
 0x38d   : > { %v1507_v8 = vpop.f32.mrf.mxu1  ;;  %v1548_v33 = vpop.f32.mrf.mxu0 }
 0x38e   : > { %v1508_v35 = vadd.f32 %v1507_v8, %v732_v19  ;;  %v1549_v13 = vadd.f32 %v1548_v33, %v740_v37 }
 0x38f   : > { %v1509_v38 = vpop.f32.mrf.mxu1  ;;  %v1550_v39 = vpop.f32.mrf.mxu0 }
 0x390   : > { %v1555_v10 = vadd.f32 %v1508_v35, %v1506_v34 }
 0x391   : > { %v1510_v11 = vpop.f32.mrf.mxu1  ;;  %v1551_v12 = vpop.f32.mrf.mxu0 }
 0x392   : > { %v1556_v14 = vadd.f32 %v1555_v10, %v1547_v9 }
 0x394   : > { %v1557_v15 = vadd.f32 %v1556_v14, %v1549_v13 }
 0x396   : > { %1558 = vadd.xlane.f32.xlu1 %v1557_v15 }
 0x41f   : > { %v1559_v16 = vpop.xlane.xlu1 %1558 }
 0x420   : > { %v1561_v17 = vmul.f32 0.001953125, %v1559_v16 }
 0x422   : > { %v1562_v20 = vsub.f32 %v1506_v34, %v1561_v17  ;;  %v1563_v21 = vsub.f32 %v1508_v35, %v1561_v17  ;;  %v1564_v22 = vsub.f32 %v1547_v9, %v1561_v17  ;;  %v1565_v23 = vsub.f32 %v1549_v13, %v1561_v17 }
 0x424   : > { %v1566_v24 = vmul.f32 %v1562_v20, %v1562_v20  ;;  %v1567_v25 = vmul.f32 %v1563_v21, %v1563_v21  ;;  %v1568_v26 = vmul.f32 %v1564_v22, %v1564_v22  ;;  %v1569_v28 = vmul.f32 %v1565_v23, %v1565_v23 }
 0x426   : > { %v1570_v27 = vadd.f32 %v1567_v25, %v1566_v24 }
 0x428   : > { %v1571_v29 = vadd.f32 %v1570_v27, %v1568_v26 }
 0x42a   : > { %v1572_v30 = vadd.f32 %v1571_v29, %v1569_v28 }
 0x42c   : > { %1573 = vadd.xlane.f32.xlu1 %v1572_v30 }
 0x4b5   : > { %v1574_v31 = vpop.xlane.xlu1 %1573 }
 0x4b6   : > { %v1575_v32 = vmul.f32 0.001953125, %v1574_v31 }
 0x4b8   : > { %v1576_v36 = vadd.f32 1e-05, %v1575_v32 }
 0x4ba   : > { %2107 = vrsqrt.f32 %v1576_v36 }
 0x4c7   : > { %v2108_v48 = vpop.eup %2107 }
 0x4c8   : > { %v1578_v62 = vmul.f32 %v2108_v48, %v1562_v20  ;;  %v1579_v5 = vmul.f32 %v2108_v48, %v1563_v21  ;;  %v1580_v57 = vmul.f32 %v2108_v48, %v1564_v22  ;;  %v1581_v63 = vmul.f32 %v2108_v48, %v1565_v23 }
 0x4ca   : > { %v1603_v58 = vmul.f32 %v1586_v44, %v1578_v62  ;;  %v1604_v55 = vmul.f32 %v1590_v45, %v1579_v5  ;;  %v1605_v0 = vmul.f32 %v1594_v46, %v1580_v57  ;;  %v1606_v56 = vmul.f32 %v1598_v47, %v1581_v63 }
 0x4cc   : > { %v2581_v18 = vadd.f32 %v1611_v49, %v1603_v58  ;;  %v2583_v19 = vadd.f32 %v1615_v50, %v1604_v55  ;;  %v2585_v1 = vadd.f32 %v1619_v51, %v1605_v0  ;;  %v2587_v2 = vadd.f32 %v1623_v52, %v1606_v56 }
 0x4ce   : > { %v2590_v3 = vmul.f32 0.70710677, %v2581_v18  ;;  %v2593_v4 = vmul.f32 0.70710677, %v2583_v19  ;;  %v2596_v8 = vmul.f32 0.70710677, %v2585_v1 }
 0x4cf   : > { %v2599_v33 = vmul.f32 0.70710677, %v2587_v2 }
 0x4d0   : > { %v1640_v34 = vand.u32 2147483647, %v2590_v3  ;;  %v1641_v35 = vand.u32 2147483647, %v2593_v4  ;;  %v1642_v37 = vand.u32 2147483647, %v2596_v8 }
 0x4d1   : > { %v1643_v38 = vand.u32 2147483647, %v2599_v33  ;;  %vm1720_vm4 = vcmp.lt.f32.partialorder %v2590_v3, 0.0  ;;  %vm1721_vm5 = vcmp.lt.f32.partialorder %v2593_v4, 0.0  ;;  %vm1722_vm6 = vcmp.lt.f32.partialorder %v2596_v8, 0.0 }
 0x4d2   : > { %v1644_v39 = vmul.f32 0.3275911, %v1640_v34  ;;  %v1645_v9 = vmul.f32 0.3275911, %v1641_v35  ;;  %v1646_v10 = vmul.f32 0.3275911, %v1642_v37  ;;  %v1696_v16 = vmul.f32 %v1640_v34, %v1640_v34 }
 0x4d3   : > { %v1647_v11 = vmul.f32 0.3275911, %v1643_v38  ;;  %v1697_v17 = vmul.f32 %v1641_v35, %v1641_v35  ;;  %v1698_v20 = vmul.f32 %v1642_v37, %v1642_v37  ;;  %v1699_v21 = vmul.f32 %v1643_v38, %v1643_v38 }
 0x4d4   : > { %v1648_v12 = vadd.f32 1.0, %v1644_v39  ;;  %v1649_v13 = vadd.f32 1.0, %v1645_v9  ;;  %v1650_v14 = vadd.f32 1.0, %v1646_v10  ;;  %v1700_v22 = vsub.f32 0.0, %v1696_v16 }
 0x4d5   : > { %v1651_v15 = vadd.f32 1.0, %v1647_v11  ;;  %v1701_v23 = vsub.f32 0.0, %v1697_v17  ;;  %v1702_v24 = vsub.f32 0.0, %v1698_v20  ;;  %v1703_v26 = vsub.f32 0.0, %v1699_v21 }
 0x4d6   : > { %2109 = vrcp.f32 %v1648_v12  ;;  %v1704_v29 = vmul.f32 1.442695, %v1700_v22  ;;  %vm1723_vm7 = vcmp.lt.f32.partialorder %v2599_v33, 0.0  ;;  %v1634_v3 = vmul.f32 0.5, %v2585_v1 }
 0x4d7   : > { %2111 = vrcp.f32 %v1649_v13  ;;  %v1706_v32 = vmul.f32 1.442695, %v1701_v23  ;;  %v1708_v44 = vmul.f32 1.442695, %v1702_v24  ;;  %v1710_v47 = vmul.f32 1.442695, %v1703_v26 }
 0x4d8   : > { %2113 = vrcp.f32 %v1650_v14 }
 0x4d9   : > { %2115 = vrcp.f32 %v1651_v15 }
 0x4da   : > { %2117 = vpow2.f32 %v1704_v29 }
 0x4db   : > { %2119 = vpow2.f32 %v1706_v32 }
 0x4dc   : > { %2121 = vpow2.f32 %v1708_v44 }
 0x4dd   : > { %2123 = vpow2.f32 %v1710_v47 }
 0x4e3   : > { %v2110_v25 = vpop.eup %2109 }
 0x4e4   : > { %v2112_v27 = vpop.eup %2111  ;;  %v1660_v28 = vmul.f32 1.0614054, %v2110_v25 }
 0x4e5   : > { %v2114_v30 = vpop.eup %2113  ;;  %v1661_v31 = vmul.f32 1.0614054, %v2112_v27 }
 0x4e6   : > { %v2116_v36 = vpop.eup %2115  ;;  %v1662_v40 = vmul.f32 1.0614054, %v2114_v30  ;;  %v1664_v42 = vadd.f32 -1.4531521, %v1660_v28  ;;  %v712_v28 = vrot.slane %v2554_v61, %v2491_v6 }
 0x4e7   : > { %v1663_v45 = vmul.f32 1.0614054, %v2116_v36  ;;  %v1665_v46 = vadd.f32 -1.4531521, %v1661_v31  ;;  %v2118_v17 = vpop.eup %2117 }
 0x4e8   : > { %v1666_v48 = vadd.f32 -1.4531521, %v1662_v40  ;;  %v1668_v49 = vmul.f32 %v2110_v25, %v1664_v42  ;;  %v2120_v22 = vpop.eup %2119  ;;  %v1424_v6 = vadd.f32 %v2540_v53, %v712_v28  ;;  %v1633_v53 = vmul.f32 0.5, %v2583_v19 }
 0x4e9   : > { %v1667_v50 = vadd.f32 -1.4531521, %v1663_v45  ;;  %v1669_v51 = vmul.f32 %v2112_v27, %v1665_v46  ;;  %v2122_v26 = vpop.eup %2121 }
 0x4ea   : > { %v1670_v52 = vmul.f32 %v2114_v30, %v1666_v48  ;;  %v1672_v62 = vadd.f32 1.4214138, %v1668_v49  ;;  %v2124_v32 = vpop.eup %2123 }
 0x4eb   : > { %v1671_v5 = vmul.f32 %v2116_v36, %v1667_v50  ;;  %v1673_v57 = vadd.f32 1.4214138, %v1669_v51 }
 0x4ec   : > { %v1674_v63 = vadd.f32 1.4214138, %v1670_v52  ;;  %v1676_v58 = vmul.f32 %v2110_v25, %v1672_v62 }
 0x4ed   : > { %v1675_v55 = vadd.f32 1.4214138, %v1671_v5  ;;  %v1677_v0 = vmul.f32 %v2112_v27, %v1673_v57  ;;  %v1635_v57 = vmul.f32 0.5, %v2587_v2 }
 0x4ee   : > { %v1678_v56 = vmul.f32 %v2114_v30, %v1674_v63  ;;  %v1680_v34 = vadd.f32 -0.28449672, %v1676_v58 }
 0x4ef   : > { %v1679_v35 = vmul.f32 %v2116_v36, %v1675_v55  ;;  %v1681_v37 = vadd.f32 -0.28449672, %v1677_v0 }
 0x4f0   : > { %v1682_v38 = vadd.f32 -0.28449672, %v1678_v56  ;;  %v1684_v39 = vmul.f32 %v2110_v25, %v1680_v34 }
 0x4f1   : > { %v1683_v9 = vadd.f32 -0.28449672, %v1679_v35  ;;  %v1685_v10 = vmul.f32 %v2112_v27, %v1681_v37 }
 0x4f2   : > { %v1686_v11 = vmul.f32 %v2114_v30, %v1682_v38  ;;  %v1688_v12 = vadd.f32 0.2548296, %v1684_v39 }
 0x4f3   : > { %v1687_v13 = vmul.f32 %v2116_v36, %v1683_v9  ;;  %v1689_v14 = vadd.f32 0.2548296, %v1685_v10 }
 0x4f4   : > { %v1690_v15 = vadd.f32 0.2548296, %v1686_v11  ;;  %v1692_v16 = vmul.f32 %v2110_v25, %v1688_v12  ;;  %v720_v25 = vrot.slane %v2554_v61, %v2565_v41  ;;  %v1632_v41 = vmul.f32 0.5, %v2581_v18 }
 0x4f5   : > { %v1691_v20 = vadd.f32 0.2548296, %v1687_v13  ;;  %v1693_v21 = vmul.f32 %v2112_v27, %v1689_v14  ;;  %v716_v27 = vrot.slane %v2554_v61, %v2494_v7 }
 0x4f6   : > { %v1694_v23 = vmul.f32 %v2114_v30, %v1690_v15  ;;  %v1712_v24 = vmul.f32 %v2118_v17, %v1692_v16  ;;  %v724_v30 = vrot.slane %v2554_v61, %v2571_v43  ;;  %v1465_v58 = vadd.f32 %v2542_v54, %v720_v25 }
 0x4f7   : > { %v1695_v29 = vmul.f32 %v2116_v36, %v1691_v20  ;;  %v1713_v31 = vmul.f32 %v2120_v22, %v1693_v21  ;;  %v1426_v4 = vadd.f32 %v2544_v59, %v716_v27 }
 0x4f8   : > { %v1714_v40 = vmul.f32 %v2122_v26, %v1694_v23  ;;  %v1716_v42 = vsub.f32 1.0, %v1712_v24  ;;  %v1467_v1 = vadd.f32 %v2546_v60, %v724_v30 }
 0x4f9   : > { %v1715_v44 = vmul.f32 %v2124_v32, %v1695_v29  ;;  %v1717_v45 = vsub.f32 1.0, %v1713_v31 }
 0x4fa   : > { %v1718_v46 = vsub.f32 1.0, %v1714_v40  ;;  %v1724_v47 = vsub.f32 0.0, %v1716_v42 }
 0x4fb   : > { %v1719_v36 = vsub.f32 1.0, %v1715_v44  ;;  %v1725_v48 = vsub.f32 0.0, %v1717_v45 }
 0x4fc   : > { %v1726_v49 = vsub.f32 0.0, %v1718_v46  ;;  %v1728_v50 = vsel %vm1720_vm4, %v1724_v47, %v1716_v42 }
 0x4fd   : > { %v1727_v7 = vsub.f32 0.0, %v1719_v36  ;;  %v1729_v61 = vsel %vm1721_vm5, %v1725_v48, %v1717_v45  ;;  %v1732_v43 = vadd.f32 1.0, %v1728_v50 }
 0x4fe   : > { %v1730_v51 = vsel %vm1722_vm6, %v1726_v49, %v1718_v46  ;;  %v1733_v52 = vadd.f32 1.0, %v1729_v61 }
 0x4ff   : > { %v1731_v62 = vsel %vm1723_vm7, %v1727_v7, %v1719_v36  ;;  %v1734_v18 = vadd.f32 1.0, %v1730_v51  ;;  %v1736_v5 = vmul.f32 %v1732_v43, %v1632_v41 }
 0x500   : > { %v1735_v8 = vadd.f32 1.0, %v1731_v62  ;;  %v1737_v63 = vmul.f32 %v1733_v52, %v1633_v53 }
 0x501   : > { %v1738_v55 = vmul.f32 %v1734_v18, %v1634_v3  ;;  %v1740_v19 = vadd.f32 %v1736_v5, %v1424_v6 }
 0x502   : > { %v1739_v33 = vmul.f32 %v1735_v8, %v1635_v57  ;;  %v1741_v0 = vadd.f32 %v1737_v63, %v1426_v4 }
 0x503   : > { %v1742_v56 = vadd.f32 %v1738_v55, %v1465_v58  ;;  %1744 = vst [vmem:[%s376_s14] sm:$0xff] %v1740_v19 }
 0x504   : > { %v1743_v59 = vadd.f32 %v1739_v33, %v1467_v1  ;;  %1745 = vst [vmem:[%s376_s14 + $0x8] sm:$0xff] %v1741_v0 }
 0x505   : > { %1746 = vst [vmem:[%s376_s14 + $0x10] sm:$0xff] %v1742_v56 }
 0x506   : > { %1747 = vst [vmem:[%s376_s14 + $0x18] sm:$0xff] %v1743_v59 }
 0x507   : > { %2242 = shalt.err (!%p2239_p4)
}
 0x508   : > { %s2243_s29 = scalar_lea.hbm %s2632_s24, 512  ;;  %s2247_s14 = scalar_lea.hbm %s2678_s9, 1024 }
 0x509   : > { %p2244_p13 = scmp.ne.s32.totalorder %s2632_s24, %s2243_s29  ;;  %p2248_p10 = scmp.lt.s32.totalorder %s2632_s24, %s2678_s9 }
 0x50a   : > { %p2249_p12 = scmp.lt.s32.totalorder %s2247_s14, %s2243_s29 }
 0x50b   : > { %p2245_p5 = pnand %p2244_p13, %p2693_p11 }
 0x50c   : > { %p2250_p7 = por %p2249_p12, %p2248_p10 }
 0x50d   : > { %p2246_p6 = pneg %p2245_p5 }
 0x50f   : > { %p2251_p8 = pnand %p2250_p7, %p2246_p6 }
 0x511   : > { %2254 = shalt.err (!%p2251_p8)
}
 0x512   : > { %2030 = dma.vmem_to_hbm [thread:$0]  (%p2693_p11), %s1764_s16, 512, %s2632_s24, %s1749_s13  }
 0x513 PF: > { %p2057_p0 = scmp.ge.s32.totalorder %s2301_s12, 2  ;;  %s1775_s28 = sand.u32 1, %s2289_s30  }
 0x514   : > { %p2694_p1 = scmp.ne.s32.totalorder %s2683_s20, 0  ;;  %s1776_s21 = scalar_lea.sflag [#allocation4], %s1775_s28 }
 0x516   : > { %p2046_p2 = pnand %p2057_p0, %p2694_p1 }
 0x518   : > { %p2047_p9 = pneg %p2046_p2 }
 0x51a   : > { %2284 = dma.done.wait (%p2047_p9), %s1776_s21, 512  }
 0x51b   : > { %2286 = vsyncadd (%p2047_p9), %s1776_s21, 4294966784  ;;  %p22_p3 = scmp.ge.s32.totalorder %s2386_s15, 4   ;;  %s2695_s30 = smov %s2293_s10 }
 0x51c   : > { %s2696_s10 = smov %s2297_s11  ;;  %s2697_s11 = smov %s2397_s18 }
 0x51d   : > { %s2698_s12 = smov %s2386_s15  ;;  %24 = sbr.rel (!%p22_p3) target bundleno = 6 (0x6), region = 108 }
 0x522   :  { %1781 = vsyncpa [#allocation3], 1 }
 0x523   :  { %1783 = vsyncpa [#allocation3 + $0x1], 1 }
 0x524   :  { %1784 = vsyncpa [#allocation6], 1 }
 0x525   :  { %1785 = vsyncpa [#allocation9], 1 }
 0x526   :  { %1786 = vsyncpa [#allocation4], 1 }
 0x527   :  { %1788 = vsyncpa [#allocation4 + $0x1], 1 }

</bundles_post_ra>
